<compile_context>
chip_gen: v7x
topology: tpu7x:2x2x1
jax: 0.10.0
libtpu: 0.0.40
codegen_flags: <defaults>
</compile_context>

<pallas_src>
import functools

import jax
import jax.numpy as jnp
from jax.experimental import pallas as pl
from jax.experimental.pallas import tpu as pltpu

K = 7            # conv kernel size
PAD = K // 2     # 'same' padding


def _spatial_attention_kernel(w_ref, x_ref, o_ref, sum_ref, max_ref, pad_ref,
                              *, H, W, lpad, g, c_sub, c_valid, mask_tail):
    # w_ref:   SMEM (2*K*K,) f32       conv weights, channel-0 pre-scaled by 1/C
    # x_ref:   VMEM (c_tile, H*W)      lane-dense channel tile of one batch elem
    # o_ref:   VMEM (1, H*W)
    # sum_ref: VMEM (g, H*W) f32       running channel sum (full sublane density)
    # max_ref: VMEM (g, H*W) x.dtype   running channel max (native dtype)
    # pad_ref: VMEM (2, H*W + 2*lpad)  pre-padded stacked [sum; max] maps
    HW = H * W
    Wr = HW + 2 * PAD
    KK = K * K
    c_step = pl.program_id(1)
    num_c = pl.num_programs(1)
    c_tile = g * c_sub

    @pl.when(c_step == 0)
    def _init():
        sum_ref[...] = jnp.zeros_like(sum_ref)
        max_ref[...] = jnp.full_like(max_ref, -jnp.inf)
        # Only the pad lanes need to be zero; the centre window is overwritten
        # in the finalize step of every batch element.
        pad_ref[:, :lpad] = jnp.zeros((2, lpad), jnp.float32)
        pad_ref[:, lpad + HW:] = jnp.zeros((2, lpad), jnp.float32)

    # ---- streaming channel reduction at full sublane density ---------------
    x3 = x_ref[...].reshape(c_sub, g, HW)                 # native dtype view
    sum_ref[...] = sum_ref[...] + jnp.sum(x3.astype(jnp.float32), axis=0)
    if mask_tail:
        # Zero-padded tail channels: harmless for the sum, mask for the max.
        ch = (c_step * c_tile
              + jax.lax.broadcasted_iota(jnp.int32, (c_sub, g, 1), 0) * g
              + jax.lax.broadcasted_iota(jnp.int32, (c_sub, g, 1), 1))
        x3 = jnp.where(ch < c_valid, x3, -jnp.inf)
    max_ref[...] = jnp.maximum(max_ref[...], jnp.max(x3, axis=0))

    # ---- finalize: separable 7x7 conv + sigmoid -----------------------------
    @pl.when(c_step == num_c - 1)
    def _finalize():
        # One g -> 1 cross-sublane reduce per map, then write both maps stacked
        # into the centre window of the pre-padded scratch buffer.
        s_row = jnp.sum(sum_ref[...], axis=0, keepdims=True)               # (1, HW)
        m_row = jnp.max(max_ref[...], axis=0, keepdims=True).astype(jnp.float32)
        pad_ref[:, lpad:lpad + HW] = jnp.concatenate([s_row, m_row], axis=0)

        # 7 row-shifted (dy*W) views of the stacked padded map, shared across
        # all kw taps.  Each view is wide enough (HW + 2*PAD) for the later
        # per-kw dx shift.  Out-of-range rows land in the zero pad lanes.
        rows = []
        for kh in range(K):
            start = lpad + (kh - PAD) * W - PAD
            rows.append(pad_ref[:, start:start + Wr])                      # (2, Wr)

        is_c0 = jax.lax.broadcasted_iota(jnp.int32, (2, Wr), 0) == 0
        col = jax.lax.broadcasted_iota(jnp.int32, (2, HW), 1) % W

        acc = jnp.zeros((2, HW), jnp.float32)
        for kw in range(K):                      # one dx shift + mask per kw
            dx = kw - PAD
            part = jnp.zeros((2, Wr), jnp.float32)
            for kh in range(K):
                # (2, ·) channel weight pair: row 0 = sum weight (1/C folded),
                # row 1 = max weight.
                wv = jnp.where(is_c0,
                               w_ref[kh * K + kw],
                               w_ref[KK + kh * K + kw])
                part = part + wv * rows[kh]
            shifted = part[:, PAD + dx:PAD + dx + HW]                      # (2, HW)
            if dx == 0:
                acc = acc + shifted
            else:
                col_ok = jnp.logical_and(col + dx >= 0, col + dx < W)
                acc = acc + jnp.where(col_ok, shifted, 0.0)

        y = jnp.sum(acc, axis=0, keepdims=True)      # single 2 -> 1 sublane sum
        o_ref[...] = jax.nn.sigmoid(y).astype(o_ref.dtype)


def _round_up(a, b):
    return -(-a // b) * b


def _vmem_budget():
    """(max bytes per input block, vmem_limit_bytes), per TPU generation."""
    vmem_cap = 64 * 1024 * 1024
    try:
        info = pltpu.get_tpu_info()
        vmem_cap = int(getattr(info, "vmem_capacity_bytes", vmem_cap) or vmem_cap)
    except Exception:
        pass
    if vmem_cap >= 96 * 1024 * 1024:          # v5e / v6e: 128 MiB physical VMEM
        return 16 * 1024 * 1024, 96 * 1024 * 1024
    return 8 * 1024 * 1024, 48 * 1024 * 1024  # v7x (64 MiB) or unknown


def _pick_c_tile(C, HW, itemsize, max_block_bytes):
    """Channel tile: full C if it fits the budget, otherwise a multiple of the
    dtype sublane pack that never exceeds the per-block byte budget."""
    pack = 8 * max(1, 4 // itemsize)                 # f32: 8, bf16: 16, int8: 32
    cap = max(1, max_block_bytes // (itemsize * HW))
    if C <= cap:
        return C                                     # one block spans all channels
    # Must tile below C: prefer exact multiple-of-pack divisors of C.
    best = 0
    t = pack
    while t <= cap:
        if C % t == 0:
            best = t
        t += pack
    if best:
        return best
    # No exact divisor fits the budget: largest pack multiple <= cap; the
    # wrapper zero-pads the channel axis and the kernel masks the tail rows.
    return max(pack, (cap // pack) * pack)


def spatial_attention(x, weight):
    """x: (N, C, H, W); weight: (1, 2, K, K) -> (N, 1, H, W)."""
    N, C, H, W = x.shape
    HW = H * W
    # Lane-aligned zero padding for the flat conv taps (>= PAD*W + PAD).
    lpad = _round_up(PAD * W + PAD, 128)
    Wp = HW + 2 * lpad

    # Fold the 1/C of the channel mean into the channel-0 conv weights.
    scale = jnp.array([1.0 / C, 1.0], jnp.float32).reshape(1, 2, 1, 1)
    w_flat = (weight.astype(jnp.float32) * scale).reshape(-1)      # (2*K*K,)

    block_bytes, vmem_limit = _vmem_budget()
    itemsize = jnp.dtype(x.dtype).itemsize
    c_tile = _pick_c_tile(C, HW, itemsize, block_bytes)
    C_pad = _round_up(C, c_tile)

    x_flat = x.reshape(N, C, HW)
    if C_pad != C:
        x_flat = jnp.pad(x_flat, ((0, 0), (0, C_pad - C), (0, 0)))

    # Sublane group for the running accumulators (8 whenever possible).
    g = 1
    for d in range(2, 9):
        if c_tile % d == 0:
            g = d
    c_sub = c_tile // g
    grid = (N, C_pad // c_tile)

    kernel = functools.partial(
        _spatial_attention_kernel, H=H, W=W, lpad=lpad, g=g, c_sub=c_sub,
        c_valid=C, mask_tail=(C_pad != C))

    out_flat = pl.pallas_call(
        kernel,
        out_shape=jax.ShapeDtypeStruct((N, 1, HW), x.dtype),
        grid_spec=pltpu.PrefetchScalarGridSpec(
            num_scalar_prefetch=0,
            grid=grid,
            in_specs=[
                pl.BlockSpec(memory_space=pltpu.SMEM),                      # weights
                pl.BlockSpec((None, c_tile, HW), lambda n, c: (n, c, 0)),   # x tile
            ],
            out_specs=pl.BlockSpec((None, 1, HW), lambda n, c: (n, 0, 0)),
            scratch_shapes=[
                pltpu.VMEM((g, HW), jnp.float32),    # running channel sum
                pltpu.VMEM((g, HW), x.dtype),        # running channel max (native)
                pltpu.VMEM((2, Wp), jnp.float32),    # pre-padded [sum; max] maps
            ],
        ),
        compiler_params=pltpu.CompilerParams(
            dimension_semantics=("parallel", "arbitrary"),
            vmem_limit_bytes=vmem_limit,
        ),
    )(w_flat, x_flat)

    return out_flat.reshape(N, 1, H, W)


def _reference(x, weight):
    """Plain-JAX reference mirroring the PyTorch forward."""
    avg_out = jnp.mean(x, axis=1, keepdims=True)
    max_out = jnp.max(x, axis=1, keepdims=True)
    cat = jnp.concatenate([avg_out, max_out], axis=1)
    y = jax.lax.conv_general_dilated(
        cat, weight, window_strides=(1, 1),
        padding=[(PAD, PAD), (PAD, PAD)],
        dimension_numbers=("NCHW", "OIHW", "NCHW"))
    return jax.nn.sigmoid(y)


if __name__ == "__main__":
    key = jax.random.PRNGKey(0)
    kx, kw_key = jax.random.split(key)

    N, C, H, W = 2, 4, 16, 16
    x = jax.random.normal(kx, (N, C, H, W), dtype=jnp.float32)

    # Deterministic init mimicking PyTorch's default Conv2d init
    # (uniform in [-1/sqrt(fan_in), 1/sqrt(fan_in)], fan_in = 2*K*K).
    fan_in = 2 * K * K
    bound = 1.0 / (fan_in ** 0.5)
    weight = jax.random.uniform(kw_key, (1, 2, K, K), dtype=jnp.float32,
                                minval=-bound, maxval=bound)

    out = spatial_attention(x, weight)
    out = jax.block_until_ready(out)

    ref = _reference(x, weight)
    assert out.shape == (N, 1, H, W)
    assert jnp.allclose(out, ref, atol=1e-5, rtol=1e-5), "mismatch vs reference"

    print("KERNEL_OK")
</pallas_src>

<mosaic_0001>
module attributes {stable_mosaic.version = 11 : i64} {
  func.func @_spatial_attention_kernel(%arg0: i32, %arg1: i32, %arg2: memref<98xf32, #tpu.memory_space<smem>>, %arg3: memref<1x4x256xf32, #tpu.memory_space<vmem>>, %arg4: memref<1x1x256xf32, #tpu.memory_space<vmem>>, %arg5: memref<4x256xf32, #tpu.memory_space<vmem>>, %arg6: memref<4x256xf32, #tpu.memory_space<vmem>>, %arg7: memref<2x512xf32, #tpu.memory_space<vmem>>) attributes {dimension_semantics = [#tpu.dimension_semantics<parallel>, #tpu.dimension_semantics<arbitrary>], iteration_bounds = array<i64: 2, 1>, scalar_prefetch = 0 : i64, scratch_operands = 3 : i64, tpu.core_type = #tpu.core_type<tc>, window_params = [{transform_indices = @transform_0, window_bounds = array<i64: 98>}, {transform_indices = @transform_1, window_bounds = array<i64: 1, 4, 256>}, {transform_indices = @transform_2, window_bounds = array<i64: 1, 1, 256>}]} {
    %c0_i32 = arith.constant 0 : i32
    %0 = arith.cmpi eq, %arg1, %c0_i32 : i32
    %1 = arith.extui %0 : i1 to i32
    %c0_i32_0 = arith.constant 0 : i32
    %2 = arith.cmpi ne, %1, %c0_i32_0 : i32
    scf.if %2 {
      %cst_14 = arith.constant 0.000000e+00 : f32
      %17 = vector.broadcast %cst_14 : f32 to vector<4x256xf32>
      %c0_15 = arith.constant 0 : index
      %c0_16 = arith.constant 0 : index
      %18 = vector.load %arg5[%c0_15, %c0_16] : memref<4x256xf32, #tpu.memory_space<vmem>>, vector<4x256xf32>
      tpu.vector_store %arg5[%c0_15, %c0_16], %17 {strides = array<i32>} : memref<4x256xf32, #tpu.memory_space<vmem>>, vector<4x256xf32>,
      %cst_17 = arith.constant 0xFF800000 : f32
      %19 = vector.broadcast %cst_17 : f32 to vector<4x256xf32>
      %c0_18 = arith.constant 0 : index
      %c0_19 = arith.constant 0 : index
      %20 = vector.load %arg6[%c0_18, %c0_19] : memref<4x256xf32, #tpu.memory_space<vmem>>, vector<4x256xf32>
      tpu.vector_store %arg6[%c0_18, %c0_19], %19 {strides = array<i32>} : memref<4x256xf32, #tpu.memory_space<vmem>>, vector<4x256xf32>,
      %cst_20 = arith.constant 0.000000e+00 : f32
      %21 = vector.broadcast %cst_20 : f32 to vector<2x128xf32>
      %c0_21 = arith.constant 0 : index
      %c0_22 = arith.constant 0 : index
      %22 = vector.load %arg7[%c0_21, %c0_22] : memref<2x512xf32, #tpu.memory_space<vmem>>, vector<2x128xf32>
      tpu.vector_store %arg7[%c0_21, %c0_22], %21 {strides = array<i32>} : memref<2x512xf32, #tpu.memory_space<vmem>>, vector<2x128xf32>,
      %cst_23 = arith.constant 0.000000e+00 : f32
      %23 = vector.broadcast %cst_23 : f32 to vector<2x128xf32>
      %c0_24 = arith.constant 0 : index
      %c384 = arith.constant 384 : index
      %24 = vector.load %arg7[%c0_24, %c384] : memref<2x512xf32, #tpu.memory_space<vmem>>, vector<2x128xf32>
      tpu.vector_store %arg7[%c0_24, %c384], %23 {strides = array<i32>} : memref<2x512xf32, #tpu.memory_space<vmem>>, vector<2x128xf32>,
    } else {
    }
    %c0 = arith.constant 0 : index
    %c0_1 = arith.constant 0 : index
    %c0_2 = arith.constant 0 : index
    %3 = vector.load %arg3[%c0, %c0_1, %c0_2] : memref<1x4x256xf32, #tpu.memory_space<vmem>>, vector<1x4x256xf32>
    %4 = vector.shape_cast %3 : vector<1x4x256xf32> to vector<4x256xf32>
    %5 = vector.shape_cast %4 : vector<4x256xf32> to vector<1x4x256xf32>
    %c0_3 = arith.constant 0 : index
    %c0_4 = arith.constant 0 : index
    %6 = vector.load %arg5[%c0_3, %c0_4] : memref<4x256xf32, #tpu.memory_space<vmem>>, vector<4x256xf32>
    %cst = arith.constant dense<0.000000e+00> : vector<4x256xf32>
    %7 = vector.multi_reduction <add>, %5, %cst [0] : vector<1x4x256xf32> to vector<4x256xf32>
    %8 = arith.addf %6, %7 : vector<4x256xf32>
    %c0_5 = arith.constant 0 : index
    %c0_6 = arith.constant 0 : index
    %9 = vector.load %arg5[%c0_5, %c0_6] : memref<4x256xf32, #tpu.memory_space<vmem>>, vector<4x256xf32>
    tpu.vector_store %arg5[%c0_5, %c0_6], %8 {strides = array<i32>} : memref<4x256xf32, #tpu.memory_space<vmem>>, vector<4x256xf32>,
    %c0_7 = arith.constant 0 : index
    %c0_8 = arith.constant 0 : index
    %10 = vector.load %arg6[%c0_7, %c0_8] : memref<4x256xf32, #tpu.memory_space<vmem>>, vector<4x256xf32>
    %cst_9 = arith.constant dense<0xFF800000> : vector<4x256xf32>
    %11 = vector.multi_reduction <maximumf>, %5, %cst_9 [0] : vector<1x4x256xf32> to vector<4x256xf32>
    %12 = arith.maximumf %10, %11 : vector<4x256xf32>
    %c0_10 = arith.constant 0 : index
    %c0_11 = arith.constant 0 : index
    %13 = vector.load %arg6[%c0_10, %c0_11] : memref<4x256xf32, #tpu.memory_space<vmem>>, vector<4x256xf32>
    tpu.vector_store %arg6[%c0_10, %c0_11], %12 {strides = array<i32>} : memref<4x256xf32, #tpu.memory_space<vmem>>, vector<4x256xf32>,
    %c0_i32_12 = arith.constant 0 : i32
    %14 = arith.cmpi eq, %arg1, %c0_i32_12 : i32
    %15 = arith.extui %14 : i1 to i32
    %c0_i32_13 = arith.constant 0 : i32
    %16 = arith.cmpi ne, %15, %c0_i32_13 : i32
    scf.if %16 {
      %c0_14 = arith.constant 0 : index
      %c0_15 = arith.constant 0 : index
      %17 = vector.load %arg5[%c0_14, %c0_15] : memref<4x256xf32, #tpu.memory_space<vmem>>, vector<4x256xf32>
      %cst_16 = arith.constant dense<0.000000e+00> : vector<256xf32>
      %18 = vector.multi_reduction <add>, %17, %cst_16 [0] : vector<4x256xf32> to vector<256xf32>
      %19 = vector.shape_cast %18 : vector<256xf32> to vector<1x256xf32>
      %c0_17 = arith.constant 0 : index
      %c0_18 = arith.constant 0 : index
      %20 = vector.load %arg6[%c0_17, %c0_18] : memref<4x256xf32, #tpu.memory_space<vmem>>, vector<4x256xf32>
      %cst_19 = arith.constant dense<0xFF800000> : vector<256xf32>
      %21 = vector.multi_reduction <maximumf>, %20, %cst_19 [0] : vector<4x256xf32> to vector<256xf32>
      %22 = vector.shape_cast %21 : vector<256xf32> to vector<1x256xf32>
      %23 = tpu.concatenate %19, %22 in 0 : vector<1x256xf32>, vector<1x256xf32> -> vector<2x256xf32>
      %c0_20 = arith.constant 0 : index
      %c128 = arith.constant 128 : index
      %24 = vector.load %arg7[%c0_20, %c128] : memref<2x512xf32, #tpu.memory_space<vmem>>, vector<2x256xf32>
      tpu.vector_store %arg7[%c0_20, %c128], %23 {strides = array<i32>} : memref<2x512xf32, #tpu.memory_space<vmem>>, vector<2x256xf32>,
      %c0_21 = arith.constant 0 : index
      %c77 = arith.constant 77 : index
      %25 = vector.load %arg7[%c0_21, %c77] : memref<2x512xf32, #tpu.memory_space<vmem>>, vector<2x262xf32>
      %c0_22 = arith.constant 0 : index
      %c93 = arith.constant 93 : index
      %26 = vector.load %arg7[%c0_22, %c93] : memref<2x512xf32, #tpu.memory_space<vmem>>, vector<2x262xf32>
      %c0_23 = arith.constant 0 : index
      %c109 = arith.constant 109 : index
      %27 = vector.load %arg7[%c0_23, %c109] : memref<2x512xf32, #tpu.memory_space<vmem>>, vector<2x262xf32>
      %c0_24 = arith.constant 0 : index
      %c125 = arith.constant 125 : index
      %28 = vector.load %arg7[%c0_24, %c125] : memref<2x512xf32, #tpu.memory_space<vmem>>, vector<2x262xf32>
      %c0_25 = arith.constant 0 : index
      %c141 = arith.constant 141 : index
      %29 = vector.load %arg7[%c0_25, %c141] : memref<2x512xf32, #tpu.memory_space<vmem>>, vector<2x262xf32>
      %c0_26 = arith.constant 0 : index
      %c157 = arith.constant 157 : index
      %30 = vector.load %arg7[%c0_26, %c157] : memref<2x512xf32, #tpu.memory_space<vmem>>, vector<2x262xf32>
      %c0_27 = arith.constant 0 : index
      %c173 = arith.constant 173 : index
      %31 = vector.load %arg7[%c0_27, %c173] : memref<2x512xf32, #tpu.memory_space<vmem>>, vector<2x262xf32>
      %32 = tpu.iota {dimensions = array<i32: 0>} : vector<2x262xi32>
      %c0_i32_28 = arith.constant 0 : i32
      %33 = vector.broadcast %c0_i32_28 : i32 to vector<2x262xi32>
      %34 = arith.cmpi eq, %32, %33 : vector<2x262xi32>
      %35 = tpu.iota {dimensions = array<i32: 1>} : vector<2x256xi32>
      %c16_i32 = arith.constant 16 : i32
      %c0_i32_29 = arith.constant 0 : i32
      %36 = arith.cmpi eq, %c16_i32, %c0_i32_29 : i32
      %c1_i32 = arith.constant 1 : i32
      %37 = arith.select %36, %c1_i32, %c16_i32 : i32
      %38 = vector.broadcast %37 : i32 to vector<2x256xi32>
      %39 = arith.remsi %35, %38 : vector<2x256xi32>
      %c0_i32_30 = arith.constant 0 : i32
      %40 = vector.broadcast %c0_i32_30 : i32 to vector<2x256xi32>
      %41 = arith.cmpi ne, %39, %40 : vector<2x256xi32>
      %c0_i32_31 = arith.constant 0 : i32
      %42 = vector.broadcast %c0_i32_31 : i32 to vector<2x256xi32>
      %43 = arith.cmpi slt, %39, %42 : vector<2x256xi32>
      %c0_i32_32 = arith.constant 0 : i32
      %44 = arith.cmpi slt, %37, %c0_i32_32 : i32
      %45 = vector.broadcast %44 : i1 to vector<2x256xi1>
      %46 = vector.broadcast %45 : vector<2x256xi1> to vector<2x256xi1>
      %47 = arith.xori %43, %46 : vector<2x256xi1>
      %48 = arith.andi %47, %41 : vector<2x256xi1>
      %49 = vector.broadcast %37 : i32 to vector<2x256xi32>
      %50 = arith.addi %39, %49 : vector<2x256xi32>
      %51 = arith.select %48, %50, %39 : vector<2x256xi1>, vector<2x256xi32>
      %cst_33 = arith.constant 0.000000e+00 : f32
      %52 = vector.broadcast %cst_33 : f32 to vector<2x256xf32>
      %cst_34 = arith.constant 0.000000e+00 : f32
      %53 = vector.broadcast %cst_34 : f32 to vector<2x262xf32>
      %c0_35 = arith.constant 0 : index
      %54 = memref.load %arg2[%c0_35] : memref<98xf32, #tpu.memory_space<smem>>
      %c49 = arith.constant 49 : index
      %55 = memref.load %arg2[%c49] : memref<98xf32, #tpu.memory_space<smem>>
      %56 = vector.broadcast %54 : f32 to vector<2x262xf32>
      %57 = vector.broadcast %55 : f32 to vector<2x262xf32>
      %58 = arith.select %34, %56, %57 : vector<2x262xi1>, vector<2x262xf32>
      %59 = arith.mulf %58, %25 : vector<2x262xf32>
      %60 = arith.addf %53, %59 : vector<2x262xf32>
      %c7 = arith.constant 7 : index
      %61 = memref.load %arg2[%c7] : memref<98xf32, #tpu.memory_space<smem>>
      %c56 = arith.constant 56 : index
      %62 = memref.load %arg2[%c56] : memref<98xf32, #tpu.memory_space<smem>>
      %63 = vector.broadcast %61 : f32 to vector<2x262xf32>
      %64 = vector.broadcast %62 : f32 to vector<2x262xf32>
      %65 = arith.select %34, %63, %64 : vector<2x262xi1>, vector<2x262xf32>
      %66 = arith.mulf %65, %26 : vector<2x262xf32>
      %67 = arith.addf %60, %66 : vector<2x262xf32>
      %c14 = arith.constant 14 : index
      %68 = memref.load %arg2[%c14] : memref<98xf32, #tpu.memory_space<smem>>
      %c63 = arith.constant 63 : index
      %69 = memref.load %arg2[%c63] : memref<98xf32, #tpu.memory_space<smem>>
      %70 = vector.broadcast %68 : f32 to vector<2x262xf32>
      %71 = vector.broadcast %69 : f32 to vector<2x262xf32>
      %72 = arith.select %34, %70, %71 : vector<2x262xi1>, vector<2x262xf32>
      %73 = arith.mulf %72, %27 : vector<2x262xf32>
      %74 = arith.addf %67, %73 : vector<2x262xf32>
      %c21 = arith.constant 21 : index
      %75 = memref.load %arg2[%c21] : memref<98xf32, #tpu.memory_space<smem>>
      %c70 = arith.constant 70 : index
      %76 = memref.load %arg2[%c70] : memref<98xf32, #tpu.memory_space<smem>>
      %77 = vector.broadcast %75 : f32 to vector<2x262xf32>
      %78 = vector.broadcast %76 : f32 to vector<2x262xf32>
      %79 = arith.select %34, %77, %78 : vector<2x262xi1>, vector<2x262xf32>
      %80 = arith.mulf %79, %28 : vector<2x262xf32>
      %81 = arith.addf %74, %80 : vector<2x262xf32>
      %c28 = arith.constant 28 : index
      %82 = memref.load %arg2[%c28] : memref<98xf32, #tpu.memory_space<smem>>
      %c77_36 = arith.constant 77 : index
      %83 = memref.load %arg2[%c77_36] : memref<98xf32, #tpu.memory_space<smem>>
      %84 = vector.broadcast %82 : f32 to vector<2x262xf32>
      %85 = vector.broadcast %83 : f32 to vector<2x262xf32>
      %86 = arith.select %34, %84, %85 : vector<2x262xi1>, vector<2x262xf32>
      %87 = arith.mulf %86, %29 : vector<2x262xf32>
      %88 = arith.addf %81, %87 : vector<2x262xf32>
      %c35 = arith.constant 35 : index
      %89 = memref.load %arg2[%c35] : memref<98xf32, #tpu.memory_space<smem>>
      %c84 = arith.constant 84 : index
      %90 = memref.load %arg2[%c84] : memref<98xf32, #tpu.memory_space<smem>>
      %91 = vector.broadcast %89 : f32 to vector<2x262xf32>
      %92 = vector.broadcast %90 : f32 to vector<2x262xf32>
      %93 = arith.select %34, %91, %92 : vector<2x262xi1>, vector<2x262xf32>
      %94 = arith.mulf %93, %30 : vector<2x262xf32>
      %95 = arith.addf %88, %94 : vector<2x262xf32>
      %c42 = arith.constant 42 : index
      %96 = memref.load %arg2[%c42] : memref<98xf32, #tpu.memory_space<smem>>
      %c91 = arith.constant 91 : index
      %97 = memref.load %arg2[%c91] : memref<98xf32, #tpu.memory_space<smem>>
      %98 = vector.broadcast %96 : f32 to vector<2x262xf32>
      %99 = vector.broadcast %97 : f32 to vector<2x262xf32>
      %100 = arith.select %34, %98, %99 : vector<2x262xi1>, vector<2x262xf32>
      %101 = arith.mulf %100, %31 : vector<2x262xf32>
      %102 = arith.addf %95, %101 : vector<2x262xf32>
      %103 = vector.extract_strided_slice %102 {offsets = [0, 0], sizes = [2, 256], strides = [1, 1]} : vector<2x262xf32> to vector<2x256xf32>
      %c-3_i32 = arith.constant -3 : i32
      %104 = vector.broadcast %c-3_i32 : i32 to vector<2x256xi32>
      %105 = arith.addi %51, %104 : vector<2x256xi32>
      %c0_i32_37 = arith.constant 0 : i32
      %106 = vector.broadcast %c0_i32_37 : i32 to vector<2x256xi32>
      %107 = arith.cmpi sge, %105, %106 : vector<2x256xi32>
      %c-3_i32_38 = arith.constant -3 : i32
      %108 = vector.broadcast %c-3_i32_38 : i32 to vector<2x256xi32>
      %109 = arith.addi %51, %108 : vector<2x256xi32>
      %c16_i32_39 = arith.constant 16 : i32
      %110 = vector.broadcast %c16_i32_39 : i32 to vector<2x256xi32>
      %111 = arith.cmpi slt, %109, %110 : vector<2x256xi32>
      %112 = arith.andi %107, %111 : vector<2x256xi1>
      %cst_40 = arith.constant 0.000000e+00 : f32
      %113 = vector.broadcast %cst_40 : f32 to vector<2x256xf32>
      %114 = arith.select %112, %103, %113 : vector<2x256xi1>, vector<2x256xf32>
      %115 = arith.addf %52, %114 : vector<2x256xf32>
      %cst_41 = arith.constant 0.000000e+00 : f32
      %116 = vector.broadcast %cst_41 : f32 to vector<2x262xf32>
      %c1 = arith.constant 1 : index
      %117 = memref.load %arg2[%c1] : memref<98xf32, #tpu.memory_space<smem>>
      %c50 = arith.constant 50 : index
      %118 = memref.load %arg2[%c50] : memref<98xf32, #tpu.memory_space<smem>>
      %119 = vector.broadcast %117 : f32 to vector<2x262xf32>
      %120 = vector.broadcast %118 : f32 to vector<2x262xf32>
      %121 = arith.select %34, %119, %120 : vector<2x262xi1>, vector<2x262xf32>
      %122 = arith.mulf %121, %25 : vector<2x262xf32>
      %123 = arith.addf %116, %122 : vector<2x262xf32>
      %c8 = arith.constant 8 : index
      %124 = memref.load %arg2[%c8] : memref<98xf32, #tpu.memory_space<smem>>
      %c57 = arith.constant 57 : index
      %125 = memref.load %arg2[%c57] : memref<98xf32, #tpu.memory_space<smem>>
      %126 = vector.broadcast %124 : f32 to vector<2x262xf32>
      %127 = vector.broadcast %125 : f32 to vector<2x262xf32>
      %128 = arith.select %34, %126, %127 : vector<2x262xi1>, vector<2x262xf32>
      %129 = arith.mulf %128, %26 : vector<2x262xf32>
      %130 = arith.addf %123, %129 : vector<2x262xf32>
      %c15 = arith.constant 15 : index
      %131 = memref.load %arg2[%c15] : memref<98xf32, #tpu.memory_space<smem>>
      %c64 = arith.constant 64 : index
      %132 = memref.load %arg2[%c64] : memref<98xf32, #tpu.memory_space<smem>>
      %133 = vector.broadcast %131 : f32 to vector<2x262xf32>
      %134 = vector.broadcast %132 : f32 to vector<2x262xf32>
      %135 = arith.select %34, %133, %134 : vector<2x262xi1>, vector<2x262xf32>
      %136 = arith.mulf %135, %27 : vector<2x262xf32>
      %137 = arith.addf %130, %136 : vector<2x262xf32>
      %c22 = arith.constant 22 : index
      %138 = memref.load %arg2[%c22] : memref<98xf32, #tpu.memory_space<smem>>
      %c71 = arith.constant 71 : index
      %139 = memref.load %arg2[%c71] : memref<98xf32, #tpu.memory_space<smem>>
      %140 = vector.broadcast %138 : f32 to vector<2x262xf32>
      %141 = vector.broadcast %139 : f32 to vector<2x262xf32>
      %142 = arith.select %34, %140, %141 : vector<2x262xi1>, vector<2x262xf32>
      %143 = arith.mulf %142, %28 : vector<2x262xf32>
      %144 = arith.addf %137, %143 : vector<2x262xf32>
      %c29 = arith.constant 29 : index
      %145 = memref.load %arg2[%c29] : memref<98xf32, #tpu.memory_space<smem>>
      %c78 = arith.constant 78 : index
      %146 = memref.load %arg2[%c78] : memref<98xf32, #tpu.memory_space<smem>>
      %147 = vector.broadcast %145 : f32 to vector<2x262xf32>
      %148 = vector.broadcast %146 : f32 to vector<2x262xf32>
      %149 = arith.select %34, %147, %148 : vector<2x262xi1>, vector<2x262xf32>
      %150 = arith.mulf %149, %29 : vector<2x262xf32>
      %151 = arith.addf %144, %150 : vector<2x262xf32>
      %c36 = arith.constant 36 : index
      %152 = memref.load %arg2[%c36] : memref<98xf32, #tpu.memory_space<smem>>
      %c85 = arith.constant 85 : index
      %153 = memref.load %arg2[%c85] : memref<98xf32, #tpu.memory_space<smem>>
      %154 = vector.broadcast %152 : f32 to vector<2x262xf32>
      %155 = vector.broadcast %153 : f32 to vector<2x262xf32>
      %156 = arith.select %34, %154, %155 : vector<2x262xi1>, vector<2x262xf32>
      %157 = arith.mulf %156, %30 : vector<2x262xf32>
      %158 = arith.addf %151, %157 : vector<2x262xf32>
      %c43 = arith.constant 43 : index
      %159 = memref.load %arg2[%c43] : memref<98xf32, #tpu.memory_space<smem>>
      %c92 = arith.constant 92 : index
      %160 = memref.load %arg2[%c92] : memref<98xf32, #tpu.memory_space<smem>>
      %161 = vector.broadcast %159 : f32 to vector<2x262xf32>
      %162 = vector.broadcast %160 : f32 to vector<2x262xf32>
      %163 = arith.select %34, %161, %162 : vector<2x262xi1>, vector<2x262xf32>
      %164 = arith.mulf %163, %31 : vector<2x262xf32>
      %165 = arith.addf %158, %164 : vector<2x262xf32>
      %166 = vector.extract_strided_slice %165 {offsets = [0, 1], sizes = [2, 256], strides = [1, 1]} : vector<2x262xf32> to vector<2x256xf32>
      %c-2_i32 = arith.constant -2 : i32
      %167 = vector.broadcast %c-2_i32 : i32 to vector<2x256xi32>
      %168 = arith.addi %51, %167 : vector<2x256xi32>
      %c0_i32_42 = arith.constant 0 : i32
      %169 = vector.broadcast %c0_i32_42 : i32 to vector<2x256xi32>
      %170 = arith.cmpi sge, %168, %169 : vector<2x256xi32>
      %c-2_i32_43 = arith.constant -2 : i32
      %171 = vector.broadcast %c-2_i32_43 : i32 to vector<2x256xi32>
      %172 = arith.addi %51, %171 : vector<2x256xi32>
      %c16_i32_44 = arith.constant 16 : i32
      %173 = vector.broadcast %c16_i32_44 : i32 to vector<2x256xi32>
      %174 = arith.cmpi slt, %172, %173 : vector<2x256xi32>
      %175 = arith.andi %170, %174 : vector<2x256xi1>
      %cst_45 = arith.constant 0.000000e+00 : f32
      %176 = vector.broadcast %cst_45 : f32 to vector<2x256xf32>
      %177 = arith.select %175, %166, %176 : vector<2x256xi1>, vector<2x256xf32>
      %178 = arith.addf %115, %177 : vector<2x256xf32>
      %cst_46 = arith.constant 0.000000e+00 : f32
      %179 = vector.broadcast %cst_46 : f32 to vector<2x262xf32>
      %c2 = arith.constant 2 : index
      %180 = memref.load %arg2[%c2] : memref<98xf32, #tpu.memory_space<smem>>
      %c51 = arith.constant 51 : index
      %181 = memref.load %arg2[%c51] : memref<98xf32, #tpu.memory_space<smem>>
      %182 = vector.broadcast %180 : f32 to vector<2x262xf32>
      %183 = vector.broadcast %181 : f32 to vector<2x262xf32>
      %184 = arith.select %34, %182, %183 : vector<2x262xi1>, vector<2x262xf32>
      %185 = arith.mulf %184, %25 : vector<2x262xf32>
      %186 = arith.addf %179, %185 : vector<2x262xf32>
      %c9 = arith.constant 9 : index
      %187 = memref.load %arg2[%c9] : memref<98xf32, #tpu.memory_space<smem>>
      %c58 = arith.constant 58 : index
      %188 = memref.load %arg2[%c58] : memref<98xf32, #tpu.memory_space<smem>>
      %189 = vector.broadcast %187 : f32 to vector<2x262xf32>
      %190 = vector.broadcast %188 : f32 to vector<2x262xf32>
      %191 = arith.select %34, %189, %190 : vector<2x262xi1>, vector<2x262xf32>
      %192 = arith.mulf %191, %26 : vector<2x262xf32>
      %193 = arith.addf %186, %192 : vector<2x262xf32>
      %c16 = arith.constant 16 : index
      %194 = memref.load %arg2[%c16] : memref<98xf32, #tpu.memory_space<smem>>
      %c65 = arith.constant 65 : index
      %195 = memref.load %arg2[%c65] : memref<98xf32, #tpu.memory_space<smem>>
      %196 = vector.broadcast %194 : f32 to vector<2x262xf32>
      %197 = vector.broadcast %195 : f32 to vector<2x262xf32>
      %198 = arith.select %34, %196, %197 : vector<2x262xi1>, vector<2x262xf32>
      %199 = arith.mulf %198, %27 : vector<2x262xf32>
      %200 = arith.addf %193, %199 : vector<2x262xf32>
      %c23 = arith.constant 23 : index
      %201 = memref.load %arg2[%c23] : memref<98xf32, #tpu.memory_space<smem>>
      %c72 = arith.constant 72 : index
      %202 = memref.load %arg2[%c72] : memref<98xf32, #tpu.memory_space<smem>>
      %203 = vector.broadcast %201 : f32 to vector<2x262xf32>
      %204 = vector.broadcast %202 : f32 to vector<2x262xf32>
      %205 = arith.select %34, %203, %204 : vector<2x262xi1>, vector<2x262xf32>
      %206 = arith.mulf %205, %28 : vector<2x262xf32>
      %207 = arith.addf %200, %206 : vector<2x262xf32>
      %c30 = arith.constant 30 : index
      %208 = memref.load %arg2[%c30] : memref<98xf32, #tpu.memory_space<smem>>
      %c79 = arith.constant 79 : index
      %209 = memref.load %arg2[%c79] : memref<98xf32, #tpu.memory_space<smem>>
      %210 = vector.broadcast %208 : f32 to vector<2x262xf32>
      %211 = vector.broadcast %209 : f32 to vector<2x262xf32>
      %212 = arith.select %34, %210, %211 : vector<2x262xi1>, vector<2x262xf32>
      %213 = arith.mulf %212, %29 : vector<2x262xf32>
      %214 = arith.addf %207, %213 : vector<2x262xf32>
      %c37 = arith.constant 37 : index
      %215 = memref.load %arg2[%c37] : memref<98xf32, #tpu.memory_space<smem>>
      %c86 = arith.constant 86 : index
      %216 = memref.load %arg2[%c86] : memref<98xf32, #tpu.memory_space<smem>>
      %217 = vector.broadcast %215 : f32 to vector<2x262xf32>
      %218 = vector.broadcast %216 : f32 to vector<2x262xf32>
      %219 = arith.select %34, %217, %218 : vector<2x262xi1>, vector<2x262xf32>
      %220 = arith.mulf %219, %30 : vector<2x262xf32>
      %221 = arith.addf %214, %220 : vector<2x262xf32>
      %c44 = arith.constant 44 : index
      %222 = memref.load %arg2[%c44] : memref<98xf32, #tpu.memory_space<smem>>
      %c93_47 = arith.constant 93 : index
      %223 = memref.load %arg2[%c93_47] : memref<98xf32, #tpu.memory_space<smem>>
      %224 = vector.broadcast %222 : f32 to vector<2x262xf32>
      %225 = vector.broadcast %223 : f32 to vector<2x262xf32>
      %226 = arith.select %34, %224, %225 : vector<2x262xi1>, vector<2x262xf32>
      %227 = arith.mulf %226, %31 : vector<2x262xf32>
      %228 = arith.addf %221, %227 : vector<2x262xf32>
      %229 = vector.extract_strided_slice %228 {offsets = [0, 2], sizes = [2, 256], strides = [1, 1]} : vector<2x262xf32> to vector<2x256xf32>
      %c-1_i32 = arith.constant -1 : i32
      %230 = vector.broadcast %c-1_i32 : i32 to vector<2x256xi32>
      %231 = arith.addi %51, %230 : vector<2x256xi32>
      %c0_i32_48 = arith.constant 0 : i32
      %232 = vector.broadcast %c0_i32_48 : i32 to vector<2x256xi32>
      %233 = arith.cmpi sge, %231, %232 : vector<2x256xi32>
      %c-1_i32_49 = arith.constant -1 : i32
      %234 = vector.broadcast %c-1_i32_49 : i32 to vector<2x256xi32>
      %235 = arith.addi %51, %234 : vector<2x256xi32>
      %c16_i32_50 = arith.constant 16 : i32
      %236 = vector.broadcast %c16_i32_50 : i32 to vector<2x256xi32>
      %237 = arith.cmpi slt, %235, %236 : vector<2x256xi32>
      %238 = arith.andi %233, %237 : vector<2x256xi1>
      %cst_51 = arith.constant 0.000000e+00 : f32
      %239 = vector.broadcast %cst_51 : f32 to vector<2x256xf32>
      %240 = arith.select %238, %229, %239 : vector<2x256xi1>, vector<2x256xf32>
      %241 = arith.addf %178, %240 : vector<2x256xf32>
      %cst_52 = arith.constant 0.000000e+00 : f32
      %242 = vector.broadcast %cst_52 : f32 to vector<2x262xf32>
      %c3 = arith.constant 3 : index
      %243 = memref.load %arg2[%c3] : memref<98xf32, #tpu.memory_space<smem>>
      %c52 = arith.constant 52 : index
      %244 = memref.load %arg2[%c52] : memref<98xf32, #tpu.memory_space<smem>>
      %245 = vector.broadcast %243 : f32 to vector<2x262xf32>
      %246 = vector.broadcast %244 : f32 to vector<2x262xf32>
      %247 = arith.select %34, %245, %246 : vector<2x262xi1>, vector<2x262xf32>
      %248 = arith.mulf %247, %25 : vector<2x262xf32>
      %249 = arith.addf %242, %248 : vector<2x262xf32>
      %c10 = arith.constant 10 : index
      %250 = memref.load %arg2[%c10] : memref<98xf32, #tpu.memory_space<smem>>
      %c59 = arith.constant 59 : index
      %251 = memref.load %arg2[%c59] : memref<98xf32, #tpu.memory_space<smem>>
      %252 = vector.broadcast %250 : f32 to vector<2x262xf32>
      %253 = vector.broadcast %251 : f32 to vector<2x262xf32>
      %254 = arith.select %34, %252, %253 : vector<2x262xi1>, vector<2x262xf32>
      %255 = arith.mulf %254, %26 : vector<2x262xf32>
      %256 = arith.addf %249, %255 : vector<2x262xf32>
      %c17 = arith.constant 17 : index
      %257 = memref.load %arg2[%c17] : memref<98xf32, #tpu.memory_space<smem>>
      %c66 = arith.constant 66 : index
      %258 = memref.load %arg2[%c66] : memref<98xf32, #tpu.memory_space<smem>>
      %259 = vector.broadcast %257 : f32 to vector<2x262xf32>
      %260 = vector.broadcast %258 : f32 to vector<2x262xf32>
      %261 = arith.select %34, %259, %260 : vector<2x262xi1>, vector<2x262xf32>
      %262 = arith.mulf %261, %27 : vector<2x262xf32>
      %263 = arith.addf %256, %262 : vector<2x262xf32>
      %c24 = arith.constant 24 : index
      %264 = memref.load %arg2[%c24] : memref<98xf32, #tpu.memory_space<smem>>
      %c73 = arith.constant 73 : index
      %265 = memref.load %arg2[%c73] : memref<98xf32, #tpu.memory_space<smem>>
      %266 = vector.broadcast %264 : f32 to vector<2x262xf32>
      %267 = vector.broadcast %265 : f32 to vector<2x262xf32>
      %268 = arith.select %34, %266, %267 : vector<2x262xi1>, vector<2x262xf32>
      %269 = arith.mulf %268, %28 : vector<2x262xf32>
      %270 = arith.addf %263, %269 : vector<2x262xf32>
      %c31 = arith.constant 31 : index
      %271 = memref.load %arg2[%c31] : memref<98xf32, #tpu.memory_space<smem>>
      %c80 = arith.constant 80 : index
      %272 = memref.load %arg2[%c80] : memref<98xf32, #tpu.memory_space<smem>>
      %273 = vector.broadcast %271 : f32 to vector<2x262xf32>
      %274 = vector.broadcast %272 : f32 to vector<2x262xf32>
      %275 = arith.select %34, %273, %274 : vector<2x262xi1>, vector<2x262xf32>
      %276 = arith.mulf %275, %29 : vector<2x262xf32>
      %277 = arith.addf %270, %276 : vector<2x262xf32>
      %c38 = arith.constant 38 : index
      %278 = memref.load %arg2[%c38] : memref<98xf32, #tpu.memory_space<smem>>
      %c87 = arith.constant 87 : index
      %279 = memref.load %arg2[%c87] : memref<98xf32, #tpu.memory_space<smem>>
      %280 = vector.broadcast %278 : f32 to vector<2x262xf32>
      %281 = vector.broadcast %279 : f32 to vector<2x262xf32>
      %282 = arith.select %34, %280, %281 : vector<2x262xi1>, vector<2x262xf32>
      %283 = arith.mulf %282, %30 : vector<2x262xf32>
      %284 = arith.addf %277, %283 : vector<2x262xf32>
      %c45 = arith.constant 45 : index
      %285 = memref.load %arg2[%c45] : memref<98xf32, #tpu.memory_space<smem>>
      %c94 = arith.constant 94 : index
      %286 = memref.load %arg2[%c94] : memref<98xf32, #tpu.memory_space<smem>>
      %287 = vector.broadcast %285 : f32 to vector<2x262xf32>
      %288 = vector.broadcast %286 : f32 to vector<2x262xf32>
      %289 = arith.select %34, %287, %288 : vector<2x262xi1>, vector<2x262xf32>
      %290 = arith.mulf %289, %31 : vector<2x262xf32>
      %291 = arith.addf %284, %290 : vector<2x262xf32>
      %292 = vector.extract_strided_slice %291 {offsets = [0, 3], sizes = [2, 256], strides = [1, 1]} : vector<2x262xf32> to vector<2x256xf32>
      %293 = arith.addf %241, %292 : vector<2x256xf32>
      %cst_53 = arith.constant 0.000000e+00 : f32
      %294 = vector.broadcast %cst_53 : f32 to vector<2x262xf32>
      %c4 = arith.constant 4 : index
      %295 = memref.load %arg2[%c4] : memref<98xf32, #tpu.memory_space<smem>>
      %c53 = arith.constant 53 : index
      %296 = memref.load %arg2[%c53] : memref<98xf32, #tpu.memory_space<smem>>
      %297 = vector.broadcast %295 : f32 to vector<2x262xf32>
      %298 = vector.broadcast %296 : f32 to vector<2x262xf32>
      %299 = arith.select %34, %297, %298 : vector<2x262xi1>, vector<2x262xf32>
      %300 = arith.mulf %299, %25 : vector<2x262xf32>
      %301 = arith.addf %294, %300 : vector<2x262xf32>
      %c11 = arith.constant 11 : index
      %302 = memref.load %arg2[%c11] : memref<98xf32, #tpu.memory_space<smem>>
      %c60 = arith.constant 60 : index
      %303 = memref.load %arg2[%c60] : memref<98xf32, #tpu.memory_space<smem>>
      %304 = vector.broadcast %302 : f32 to vector<2x262xf32>
      %305 = vector.broadcast %303 : f32 to vector<2x262xf32>
      %306 = arith.select %34, %304, %305 : vector<2x262xi1>, vector<2x262xf32>
      %307 = arith.mulf %306, %26 : vector<2x262xf32>
      %308 = arith.addf %301, %307 : vector<2x262xf32>
      %c18 = arith.constant 18 : index
      %309 = memref.load %arg2[%c18] : memref<98xf32, #tpu.memory_space<smem>>
      %c67 = arith.constant 67 : index
      %310 = memref.load %arg2[%c67] : memref<98xf32, #tpu.memory_space<smem>>
      %311 = vector.broadcast %309 : f32 to vector<2x262xf32>
      %312 = vector.broadcast %310 : f32 to vector<2x262xf32>
      %313 = arith.select %34, %311, %312 : vector<2x262xi1>, vector<2x262xf32>
      %314 = arith.mulf %313, %27 : vector<2x262xf32>
      %315 = arith.addf %308, %314 : vector<2x262xf32>
      %c25 = arith.constant 25 : index
      %316 = memref.load %arg2[%c25] : memref<98xf32, #tpu.memory_space<smem>>
      %c74 = arith.constant 74 : index
      %317 = memref.load %arg2[%c74] : memref<98xf32, #tpu.memory_space<smem>>
      %318 = vector.broadcast %316 : f32 to vector<2x262xf32>
      %319 = vector.broadcast %317 : f32 to vector<2x262xf32>
      %320 = arith.select %34, %318, %319 : vector<2x262xi1>, vector<2x262xf32>
      %321 = arith.mulf %320, %28 : vector<2x262xf32>
      %322 = arith.addf %315, %321 : vector<2x262xf32>
      %c32 = arith.constant 32 : index
      %323 = memref.load %arg2[%c32] : memref<98xf32, #tpu.memory_space<smem>>
      %c81 = arith.constant 81 : index
      %324 = memref.load %arg2[%c81] : memref<98xf32, #tpu.memory_space<smem>>
      %325 = vector.broadcast %323 : f32 to vector<2x262xf32>
      %326 = vector.broadcast %324 : f32 to vector<2x262xf32>
      %327 = arith.select %34, %325, %326 : vector<2x262xi1>, vector<2x262xf32>
      %328 = arith.mulf %327, %29 : vector<2x262xf32>
      %329 = arith.addf %322, %328 : vector<2x262xf32>
      %c39 = arith.constant 39 : index
      %330 = memref.load %arg2[%c39] : memref<98xf32, #tpu.memory_space<smem>>
      %c88 = arith.constant 88 : index
      %331 = memref.load %arg2[%c88] : memref<98xf32, #tpu.memory_space<smem>>
      %332 = vector.broadcast %330 : f32 to vector<2x262xf32>
      %333 = vector.broadcast %331 : f32 to vector<2x262xf32>
      %334 = arith.select %34, %332, %333 : vector<2x262xi1>, vector<2x262xf32>
      %335 = arith.mulf %334, %30 : vector<2x262xf32>
      %336 = arith.addf %329, %335 : vector<2x262xf32>
      %c46 = arith.constant 46 : index
      %337 = memref.load %arg2[%c46] : memref<98xf32, #tpu.memory_space<smem>>
      %c95 = arith.constant 95 : index
      %338 = memref.load %arg2[%c95] : memref<98xf32, #tpu.memory_space<smem>>
      %339 = vector.broadcast %337 : f32 to vector<2x262xf32>
      %340 = vector.broadcast %338 : f32 to vector<2x262xf32>
      %341 = arith.select %34, %339, %340 : vector<2x262xi1>, vector<2x262xf32>
      %342 = arith.mulf %341, %31 : vector<2x262xf32>
      %343 = arith.addf %336, %342 : vector<2x262xf32>
      %344 = vector.extract_strided_slice %343 {offsets = [0, 4], sizes = [2, 256], strides = [1, 1]} : vector<2x262xf32> to vector<2x256xf32>
      %c1_i32_54 = arith.constant 1 : i32
      %345 = vector.broadcast %c1_i32_54 : i32 to vector<2x256xi32>
      %346 = arith.addi %51, %345 : vector<2x256xi32>
      %c0_i32_55 = arith.constant 0 : i32
      %347 = vector.broadcast %c0_i32_55 : i32 to vector<2x256xi32>
      %348 = arith.cmpi sge, %346, %347 : vector<2x256xi32>
      %c1_i32_56 = arith.constant 1 : i32
      %349 = vector.broadcast %c1_i32_56 : i32 to vector<2x256xi32>
      %350 = arith.addi %51, %349 : vector<2x256xi32>
      %c16_i32_57 = arith.constant 16 : i32
      %351 = vector.broadcast %c16_i32_57 : i32 to vector<2x256xi32>
      %352 = arith.cmpi slt, %350, %351 : vector<2x256xi32>
      %353 = arith.andi %348, %352 : vector<2x256xi1>
      %cst_58 = arith.constant 0.000000e+00 : f32
      %354 = vector.broadcast %cst_58 : f32 to vector<2x256xf32>
      %355 = arith.select %353, %344, %354 : vector<2x256xi1>, vector<2x256xf32>
      %356 = arith.addf %293, %355 : vector<2x256xf32>
      %cst_59 = arith.constant 0.000000e+00 : f32
      %357 = vector.broadcast %cst_59 : f32 to vector<2x262xf32>
      %c5 = arith.constant 5 : index
      %358 = memref.load %arg2[%c5] : memref<98xf32, #tpu.memory_space<smem>>
      %c54 = arith.constant 54 : index
      %359 = memref.load %arg2[%c54] : memref<98xf32, #tpu.memory_space<smem>>
      %360 = vector.broadcast %358 : f32 to vector<2x262xf32>
      %361 = vector.broadcast %359 : f32 to vector<2x262xf32>
      %362 = arith.select %34, %360, %361 : vector<2x262xi1>, vector<2x262xf32>
      %363 = arith.mulf %362, %25 : vector<2x262xf32>
      %364 = arith.addf %357, %363 : vector<2x262xf32>
      %c12 = arith.constant 12 : index
      %365 = memref.load %arg2[%c12] : memref<98xf32, #tpu.memory_space<smem>>
      %c61 = arith.constant 61 : index
      %366 = memref.load %arg2[%c61] : memref<98xf32, #tpu.memory_space<smem>>
      %367 = vector.broadcast %365 : f32 to vector<2x262xf32>
      %368 = vector.broadcast %366 : f32 to vector<2x262xf32>
      %369 = arith.select %34, %367, %368 : vector<2x262xi1>, vector<2x262xf32>
      %370 = arith.mulf %369, %26 : vector<2x262xf32>
      %371 = arith.addf %364, %370 : vector<2x262xf32>
      %c19 = arith.constant 19 : index
      %372 = memref.load %arg2[%c19] : memref<98xf32, #tpu.memory_space<smem>>
      %c68 = arith.constant 68 : index
      %373 = memref.load %arg2[%c68] : memref<98xf32, #tpu.memory_space<smem>>
      %374 = vector.broadcast %372 : f32 to vector<2x262xf32>
      %375 = vector.broadcast %373 : f32 to vector<2x262xf32>
      %376 = arith.select %34, %374, %375 : vector<2x262xi1>, vector<2x262xf32>
      %377 = arith.mulf %376, %27 : vector<2x262xf32>
      %378 = arith.addf %371, %377 : vector<2x262xf32>
      %c26 = arith.constant 26 : index
      %379 = memref.load %arg2[%c26] : memref<98xf32, #tpu.memory_space<smem>>
      %c75 = arith.constant 75 : index
      %380 = memref.load %arg2[%c75] : memref<98xf32, #tpu.memory_space<smem>>
      %381 = vector.broadcast %379 : f32 to vector<2x262xf32>
      %382 = vector.broadcast %380 : f32 to vector<2x262xf32>
      %383 = arith.select %34, %381, %382 : vector<2x262xi1>, vector<2x262xf32>
      %384 = arith.mulf %383, %28 : vector<2x262xf32>
      %385 = arith.addf %378, %384 : vector<2x262xf32>
      %c33 = arith.constant 33 : index
      %386 = memref.load %arg2[%c33] : memref<98xf32, #tpu.memory_space<smem>>
      %c82 = arith.constant 82 : index
      %387 = memref.load %arg2[%c82] : memref<98xf32, #tpu.memory_space<smem>>
      %388 = vector.broadcast %386 : f32 to vector<2x262xf32>
      %389 = vector.broadcast %387 : f32 to vector<2x262xf32>
      %390 = arith.select %34, %388, %389 : vector<2x262xi1>, vector<2x262xf32>
      %391 = arith.mulf %390, %29 : vector<2x262xf32>
      %392 = arith.addf %385, %391 : vector<2x262xf32>
      %c40 = arith.constant 40 : index
      %393 = memref.load %arg2[%c40] : memref<98xf32, #tpu.memory_space<smem>>
      %c89 = arith.constant 89 : index
      %394 = memref.load %arg2[%c89] : memref<98xf32, #tpu.memory_space<smem>>
      %395 = vector.broadcast %393 : f32 to vector<2x262xf32>
      %396 = vector.broadcast %394 : f32 to vector<2x262xf32>
      %397 = arith.select %34, %395, %396 : vector<2x262xi1>, vector<2x262xf32>
      %398 = arith.mulf %397, %30 : vector<2x262xf32>
      %399 = arith.addf %392, %398 : vector<2x262xf32>
      %c47 = arith.constant 47 : index
      %400 = memref.load %arg2[%c47] : memref<98xf32, #tpu.memory_space<smem>>
      %c96 = arith.constant 96 : index
      %401 = memref.load %arg2[%c96] : memref<98xf32, #tpu.memory_space<smem>>
      %402 = vector.broadcast %400 : f32 to vector<2x262xf32>
      %403 = vector.broadcast %401 : f32 to vector<2x262xf32>
      %404 = arith.select %34, %402, %403 : vector<2x262xi1>, vector<2x262xf32>
      %405 = arith.mulf %404, %31 : vector<2x262xf32>
      %406 = arith.addf %399, %405 : vector<2x262xf32>
      %407 = vector.extract_strided_slice %406 {offsets = [0, 5], sizes = [2, 256], strides = [1, 1]} : vector<2x262xf32> to vector<2x256xf32>
      %c2_i32 = arith.constant 2 : i32
      %408 = vector.broadcast %c2_i32 : i32 to vector<2x256xi32>
      %409 = arith.addi %51, %408 : vector<2x256xi32>
      %c0_i32_60 = arith.constant 0 : i32
      %410 = vector.broadcast %c0_i32_60 : i32 to vector<2x256xi32>
      %411 = arith.cmpi sge, %409, %410 : vector<2x256xi32>
      %c2_i32_61 = arith.constant 2 : i32
      %412 = vector.broadcast %c2_i32_61 : i32 to vector<2x256xi32>
      %413 = arith.addi %51, %412 : vector<2x256xi32>
      %c16_i32_62 = arith.constant 16 : i32
      %414 = vector.broadcast %c16_i32_62 : i32 to vector<2x256xi32>
      %415 = arith.cmpi slt, %413, %414 : vector<2x256xi32>
      %416 = arith.andi %411, %415 : vector<2x256xi1>
      %cst_63 = arith.constant 0.000000e+00 : f32
      %417 = vector.broadcast %cst_63 : f32 to vector<2x256xf32>
      %418 = arith.select %416, %407, %417 : vector<2x256xi1>, vector<2x256xf32>
      %419 = arith.addf %356, %418 : vector<2x256xf32>
      %cst_64 = arith.constant 0.000000e+00 : f32
      %420 = vector.broadcast %cst_64 : f32 to vector<2x262xf32>
      %c6 = arith.constant 6 : index
      %421 = memref.load %arg2[%c6] : memref<98xf32, #tpu.memory_space<smem>>
      %c55 = arith.constant 55 : index
      %422 = memref.load %arg2[%c55] : memref<98xf32, #tpu.memory_space<smem>>
      %423 = vector.broadcast %421 : f32 to vector<2x262xf32>
      %424 = vector.broadcast %422 : f32 to vector<2x262xf32>
      %425 = arith.select %34, %423, %424 : vector<2x262xi1>, vector<2x262xf32>
      %426 = arith.mulf %425, %25 : vector<2x262xf32>
      %427 = arith.addf %420, %426 : vector<2x262xf32>
      %c13 = arith.constant 13 : index
      %428 = memref.load %arg2[%c13] : memref<98xf32, #tpu.memory_space<smem>>
      %c62 = arith.constant 62 : index
      %429 = memref.load %arg2[%c62] : memref<98xf32, #tpu.memory_space<smem>>
      %430 = vector.broadcast %428 : f32 to vector<2x262xf32>
      %431 = vector.broadcast %429 : f32 to vector<2x262xf32>
      %432 = arith.select %34, %430, %431 : vector<2x262xi1>, vector<2x262xf32>
      %433 = arith.mulf %432, %26 : vector<2x262xf32>
      %434 = arith.addf %427, %433 : vector<2x262xf32>
      %c20 = arith.constant 20 : index
      %435 = memref.load %arg2[%c20] : memref<98xf32, #tpu.memory_space<smem>>
      %c69 = arith.constant 69 : index
      %436 = memref.load %arg2[%c69] : memref<98xf32, #tpu.memory_space<smem>>
      %437 = vector.broadcast %435 : f32 to vector<2x262xf32>
      %438 = vector.broadcast %436 : f32 to vector<2x262xf32>
      %439 = arith.select %34, %437, %438 : vector<2x262xi1>, vector<2x262xf32>
      %440 = arith.mulf %439, %27 : vector<2x262xf32>
      %441 = arith.addf %434, %440 : vector<2x262xf32>
      %c27 = arith.constant 27 : index
      %442 = memref.load %arg2[%c27] : memref<98xf32, #tpu.memory_space<smem>>
      %c76 = arith.constant 76 : index
      %443 = memref.load %arg2[%c76] : memref<98xf32, #tpu.memory_space<smem>>
      %444 = vector.broadcast %442 : f32 to vector<2x262xf32>
      %445 = vector.broadcast %443 : f32 to vector<2x262xf32>
      %446 = arith.select %34, %444, %445 : vector<2x262xi1>, vector<2x262xf32>
      %447 = arith.mulf %446, %28 : vector<2x262xf32>
      %448 = arith.addf %441, %447 : vector<2x262xf32>
      %c34 = arith.constant 34 : index
      %449 = memref.load %arg2[%c34] : memref<98xf32, #tpu.memory_space<smem>>
      %c83 = arith.constant 83 : index
      %450 = memref.load %arg2[%c83] : memref<98xf32, #tpu.memory_space<smem>>
      %451 = vector.broadcast %449 : f32 to vector<2x262xf32>
      %452 = vector.broadcast %450 : f32 to vector<2x262xf32>
      %453 = arith.select %34, %451, %452 : vector<2x262xi1>, vector<2x262xf32>
      %454 = arith.mulf %453, %29 : vector<2x262xf32>
      %455 = arith.addf %448, %454 : vector<2x262xf32>
      %c41 = arith.constant 41 : index
      %456 = memref.load %arg2[%c41] : memref<98xf32, #tpu.memory_space<smem>>
      %c90 = arith.constant 90 : index
      %457 = memref.load %arg2[%c90] : memref<98xf32, #tpu.memory_space<smem>>
      %458 = vector.broadcast %456 : f32 to vector<2x262xf32>
      %459 = vector.broadcast %457 : f32 to vector<2x262xf32>
      %460 = arith.select %34, %458, %459 : vector<2x262xi1>, vector<2x262xf32>
      %461 = arith.mulf %460, %30 : vector<2x262xf32>
      %462 = arith.addf %455, %461 : vector<2x262xf32>
      %c48 = arith.constant 48 : index
      %463 = memref.load %arg2[%c48] : memref<98xf32, #tpu.memory_space<smem>>
      %c97 = arith.constant 97 : index
      %464 = memref.load %arg2[%c97] : memref<98xf32, #tpu.memory_space<smem>>
      %465 = vector.broadcast %463 : f32 to vector<2x262xf32>
      %466 = vector.broadcast %464 : f32 to vector<2x262xf32>
      %467 = arith.select %34, %465, %466 : vector<2x262xi1>, vector<2x262xf32>
      %468 = arith.mulf %467, %31 : vector<2x262xf32>
      %469 = arith.addf %462, %468 : vector<2x262xf32>
      %470 = vector.extract_strided_slice %469 {offsets = [0, 6], sizes = [2, 256], strides = [1, 1]} : vector<2x262xf32> to vector<2x256xf32>
      %c3_i32 = arith.constant 3 : i32
      %471 = vector.broadcast %c3_i32 : i32 to vector<2x256xi32>
      %472 = arith.addi %51, %471 : vector<2x256xi32>
      %c0_i32_65 = arith.constant 0 : i32
      %473 = vector.broadcast %c0_i32_65 : i32 to vector<2x256xi32>
      %474 = arith.cmpi sge, %472, %473 : vector<2x256xi32>
      %c3_i32_66 = arith.constant 3 : i32
      %475 = vector.broadcast %c3_i32_66 : i32 to vector<2x256xi32>
      %476 = arith.addi %51, %475 : vector<2x256xi32>
      %c16_i32_67 = arith.constant 16 : i32
      %477 = vector.broadcast %c16_i32_67 : i32 to vector<2x256xi32>
      %478 = arith.cmpi slt, %476, %477 : vector<2x256xi32>
      %479 = arith.andi %474, %478 : vector<2x256xi1>
      %cst_68 = arith.constant 0.000000e+00 : f32
      %480 = vector.broadcast %cst_68 : f32 to vector<2x256xf32>
      %481 = arith.select %479, %470, %480 : vector<2x256xi1>, vector<2x256xf32>
      %482 = arith.addf %419, %481 : vector<2x256xf32>
      %cst_69 = arith.constant dense<0.000000e+00> : vector<256xf32>
      %483 = vector.multi_reduction <add>, %482, %cst_69 [0] : vector<2x256xf32> to vector<256xf32>
      %484 = vector.shape_cast %483 : vector<256xf32> to vector<1x256xf32>
      %485 = arith.negf %484 : vector<1x256xf32>
      %486 = math.exp %485 : vector<1x256xf32>
      %cst_70 = arith.constant 1.000000e+00 : f32
      %487 = vector.broadcast %cst_70 : f32 to vector<1x256xf32>
      %488 = arith.addf %487, %486 : vector<1x256xf32>
      %489 = arith.divf %487, %488 : vector<1x256xf32>
      %c0_71 = arith.constant 0 : index
      %c0_72 = arith.constant 0 : index
      %c0_73 = arith.constant 0 : index
      %490 = vector.load %arg4[%c0_71, %c0_72, %c0_73] : memref<1x1x256xf32, #tpu.memory_space<vmem>>, vector<1x1x256xf32>
      %491 = vector.shape_cast %490 : vector<1x1x256xf32> to vector<1x256xf32>
      %492 = vector.shape_cast %489 : vector<1x256xf32> to vector<1x1x256xf32>
      tpu.vector_store %arg4[%c0_71, %c0_72, %c0_73], %492 {strides = array<i32>} : memref<1x1x256xf32, #tpu.memory_space<vmem>>, vector<1x1x256xf32>,
    } else {
    }
    return
  }
  func.func @transform_0(%arg0: i32, %arg1: i32) -> i32 {
    %c0_i32 = arith.constant 0 : i32
    %c0_i32_0 = arith.constant 0 : i32
    return %c0_i32 : i32
  }
  func.func @transform_1(%arg0: i32, %arg1: i32) -> (i32, i32, i32) {
    %c0_i32 = arith.constant 0 : i32
    %c0_i32_0 = arith.constant 0 : i32
    return %arg0, %arg1, %c0_i32 : i32, i32, i32
  }
  func.func @transform_2(%arg0: i32, %arg1: i32) -> (i32, i32, i32) {
    %c0_i32 = arith.constant 0 : i32
    %c0_i32_0 = arith.constant 0 : i32
    %c0_i32_1 = arith.constant 0 : i32
    return %arg0, %c0_i32, %c0_i32_0 : i32, i32, i32
  }
}

</mosaic_0001>

<bundles_post_ra>
// kernel: tpu_custom_call.1
= control target key start
LH: loop header
LB: loop body
LE: loop exit
PB: predicated region body
PF: predicated region fallthrough
CT: control target
= control target key end

     0   :  { %s2769_s0 = inlined_call_operand.hbm [shape: f32[98], index: 0, kind: input, shape index: {}]   ;;  %s2770_s1 = inlined_call_operand.hbm [shape: f32[2,4,256], index: 1, kind: input, shape index: {}]   ;;  %s2771_s2 = inlined_call_operand.hbm [shape: f32[2,1,256], index: 2, kind: output, shape index: {}]  }
   0x1   :  { %2834 = sst [smem:[#allocation89_spill]] %s2769_s0 }
   0x2   :  { %2835 = sst [smem:[#allocation90_spill]] %s2770_s1 }
   0x3   :  { %2836 = sst [smem:[#allocation91_spill]] %s2771_s2 }
   0x4   :  { %7 = vsyncpa [#allocation8], 0 }
   0x5   :  { %8 = vsyncpa [#allocation6], 0 }
   0x6   :  { %10 = vsyncpa [#allocation6 + $0x1], 0 }
   0x7   :  { %11 = vsyncpa [#allocation7], 0 }
   0x8   :  { %13 = vsyncpa [#allocation7 + $0x1], 0  ;;  %s1656_s9 = smov 0   ;;  %s1658_s10 = smov 0  }
   0x9   :  { %s1660_s11 = smov 0   ;;  %s1662_s12 = smov 0  }
   0xa   :  { %s1664_s13 = smov 0   ;;  %s1666_s14 = smov 0  }
   0xb LB: > { %2837 = sst [smem:[#allocation14_spill]] %s1600_s9  ;;  %s1272_s15 = sadd.s32 4294967295, %s1620_s14   ;;  %s1620_s14 = sphi %s1666_s14, %s19_s14   ;;  %s1616_s13 = sphi %s1664_s13, %s3030_s13   ;;  %s1612_s12 = sphi %s1662_s12, %s3029_s12   ;;  %s1608_s11 = sphi %s1660_s11, %s3028_s11   ;;  %s1604_s10 = sphi %s1658_s10, %s3027_s10   ;;  %s1600_s9 = sphi %s1656_s9, %s3026_s9  }
   0xc   : > { %2838 = sst [smem:[#allocation15_spill]] %s1604_s10  ;;  %s1273_s16 = sadd.s32 4294967294, %s1620_s14  }
   0xd   : > { %2839 = sst [smem:[#allocation16_spill]] %s1608_s11  ;;  %p74_p0 = scmp.ne.s32.totalorder %s1604_s10, %s1600_s9 }
   0xe   : > { %2840 = sst [smem:[#allocation17_spill]] %s1612_s12  ;;  %p1690_p1 = scmp.eq.s32.totalorder %s1272_s15, 0 }
   0xf   : > { %2841 = sst [smem:[#allocation18_spill]] %s1616_s13  ;;  %p1694_p2 = scmp.eq.s32.totalorder %s1272_s15, 1 }
  0x10   : > { %2842 = sst [smem:[#allocation19_spill]] %s1620_s14  ;;  %p104_p3 = scmp.eq.s32.totalorder %s1273_s16, 1 }
  0x11   : > { %s2843_s17 = scalar_select %p1690_p1, 1, 0 }
  0x12   : > { %p1700_p4 = por %p1690_p1, %p74_p0  ;;  %p1274_p5 = scmp.ge.s32.totalorder %s1620_s14, 1 }
  0x13   : > { %p1705_p6 = por %p104_p3, %p74_p0  ;;  %p111_p7 = scmp.lt.s32.totalorder %s1620_s14, 3 }
  0x14   : > { %s2845_s19 = scalar_select %p1700_p4, 1, 0 }
  0x15   : > { %s2846_s20 = scalar_select %p1705_p6, 1, 0 }
  0x16   : > { %p1710_p8 = pnand %p1274_p5, %p111_p7  ;;  %s31_s22 = sadd.s32 1, %s1616_s13 }
  0x17   : > { %2847 = sst [smem:[#allocation20_spill]] %s2846_s20  ;;  %p1724_p12 = scmp.ge.s32.totalorder %s31_s22, 2 }
  0x18   : > { %p1399_p10 = pneg %p1710_p8  ;;  %s61_s25 = sadd.s32 1, %s1608_s11 }
  0x19   : > { %p68_p13 = scmp.ne.s32.totalorder %s1608_s11, %s1604_s10  ;;  %p69_p0 = scmp.eq.s32.totalorder %s1620_s14, 0 }
  0x1a   : > { %p1720_p11 = pnand %p1399_p10, %p1690_p1  ;;  %s2851_s0 = sld [smem:[#allocation89_spill]] }
  0x1c   : > { %p1493_p5 = pneg %p1720_p11 }
  0x20   : > { %s1491_s28 = scalar_lea.hbm %s2851_s0, 16 }
  0x21   : > { %p1492_p3 = scmp.ne.s32.totalorder %s2851_s0, %s1491_s28  ;;  %p1498_p9 = scmp.lt.u32.totalorder %s1491_s28, %s2851_s0 }
  0x23   : > { %p1494_p7 = pnand %p1493_p5, %p1492_p3 }
  0x25   : > { %p1495_p10 = pneg %p1494_p7 }
  0x27   : > { %p1500_p6 = pnand %p1498_p9, %p1495_p10 }
  0x29   : > { %1503 = shalt.err (!%p1500_p6)
}
  0x2a   : > { %s1622_s5 = smov [#allocation5]   ;;  %s3032_s22 = smov (%p1724_p12, %s31_s22), 0 }
  0x2b   : > { %1402 = dma.hbm_to_smem (!%p1720_p11), %s2851_s0, 16, %s1622_s5, [#allocation8]  }
  0x2c   : > { %2852 = sst [smem:[#allocation21_spill]] %s3032_s22  ;;  %p1755_p6 = por %p69_p0, %p68_p13 }
  0x2d   : > { %p1764_p9 = por %p1694_p2, %p68_p13  ;;  %s56_s16 = ssub.s32 %s1616_s13, %s3032_s22 }
  0x2e   : > { %p1412_p3 = scmp.lt.s32.totalorder %s1620_s14, 2  ;;  %p59_p5 = scmp.eq.s32.totalorder %s56_s16, 0 }
  0x2f   : > { %s2854_s15 = scalar_select %p1764_p9, 1, 0 }
  0x30   : > { %s133_s23 = sand.u32 1, %s1608_s11   ;;  %s1389_s27 = sshll.u32 %s1616_s13, 7 }
  0x31   : > { %2855 = sst [smem:[#allocation22_spill]] %s2854_s15  ;;  %s1277_s24 = sshll.u32 %s133_s23, 3 }
  0x32   : > { %s1773_s26 = scalar_select %p59_p5, %s1608_s11, %s61_s25  }
  0x33   : > { %s2857_s1 = sld [smem:[#allocation90_spill]]  ;;  %s137_s18 = scalar_lea.vmem [#allocation9], %s1277_s24 }
  0x34   : > { %2856 = sst [smem:[#allocation23_spill]] %s1773_s26  ;;  %s147_s3 = sshll.u32 %s137_s18, 4  ;;  %s1781_s3 = int_to_ptr.vmem [resolvable:$true] %s147_s3 }
  0x35   : > { %p1785_p2 = pnand %p1412_p3, %p1755_p6  ;;  %s134_s25 = scalar_lea.sflag [#allocation6], %s133_s23 }
  0x37   : > { %p1506_p12 = pneg %p1785_p2 }
  0x39   : > { %s1779_s30 = scalar_lea.hbm %s2857_s1, %s1389_s27  ;;  %s1509_s16 = scalar_lea.hbm %s2857_s1, 256 }
  0x3a   : > { %s1504_s5 = scalar_lea.hbm %s1779_s30, 128  ;;  %p1510_p7 = scmp.lt.u32.totalorder %s1779_s30, %s2857_s1 }
  0x3b   : > { %p1505_p11 = scmp.ne.s32.totalorder %s1779_s30, %s1504_s5  ;;  %p1511_p10 = scmp.lt.u32.totalorder %s1509_s16, %s1504_s5 }
  0x3c   : > { %p1513_p3 = scmp.lt.u32.totalorder %s1504_s5, %s1779_s30 }
  0x3d   : > { %p1507_p13 = pnand %p1506_p12, %p1505_p11  ;;  %p1512_p6 = por %p1511_p10, %p1510_p7 }
  0x3f   : > { %p1508_p0 = pneg %p1507_p13  ;;  %p1514_p5 = por %p1513_p3, %p1512_p6 }
  0x41   : > { %p1515_p9 = pnand %p1514_p5, %p1508_p0 }
  0x43   : > { %1518 = shalt.err (!%p1515_p9)
}
  0x44   : > { %s1519_s23 = scalar_lea.vmem %s1781_s3, 128  ;;  %s1623_s27 = smov [#allocation9]  }
  0x45   : > { %p1520_p11 = scmp.ne.s32.totalorder %s1781_s3, %s1519_s23  ;;  %s1524_s28 = sshll.u32 %s1623_s27, 4  ;;  %s1525_s28 = int_to_ptr.vmem [resolvable:$false] %s1524_s28 }
  0x46   : > { %s1526_s29 = scalar_lea.vmem %s1525_s28, 256  ;;  %p1527_p1 = scmp.lt.s32.totalorder %s1781_s3, %s1525_s28 }
  0x47   : > { %p1522_p13 = pnand %p1520_p11, %p1506_p12  ;;  %p1528_p7 = scmp.lt.s32.totalorder %s1526_s29, %s1519_s23 }
  0x49   : > { %p1523_p4 = pneg %p1522_p13  ;;  %p1529_p10 = por %p1528_p7, %p1527_p1 }
  0x4b   : > { %p1530_p6 = pnand %p1529_p10, %p1523_p4 }
  0x4d   : > { %1533 = shalt.err (!%p1530_p6)
}
  0x4e   : > { %1406 = dma.hbm_to_vmem [thread:$0]  (!%p1785_p2), %s1779_s30, 128, %s1781_s3, %s134_s25  }
  0x4f   : > { %156 = sbr.rel (%p1710_p8) target bundleno = 501 (0x1f5), region = 28 }
  0x56   : > { %p2859_p9 = scmp.ne.s32.totalorder %s2843_s17, 0 }
  0x58   : > { %1587 = dma.done.wait (%p2859_p9), [#allocation8], 16  }
  0x59   : > { %1589 = vsyncadd (%p2859_p9), [#allocation8], 4294967280  ;;  %s1821_s18 = sand.u32 1, %s1604_s10   ;;  %p2861_p1 = scmp.ne.s32.totalorder %s2845_s19, 0 }
  0x5a   : > { %2860 = sst [smem:[#allocation24_spill]] %s1821_s18  ;;  %s1282_s5 = sshll.u32 %s1821_s18, 3 }
  0x5b   : > { %s163_s4 = scalar_lea.sflag [#allocation6], %s1821_s18  ;;  %s166_s6 = scalar_lea.vmem [#allocation9], %s1282_s5 }
  0x5c   : > { %1591 = dma.done.wait (%p2861_p1), %s163_s4, 128  }
  0x5d   : > { %1593 = vsyncadd (%p2861_p1), %s163_s4, 4294967168 }
  0x5e   : > { %171 = sfence }
  0x5f   : > { %v196_v0 = vld [vmem:[%s166_s6] sm:$0xff]  ;;  %vm211_vm0 = vcmask 1043456   ;;  %v1624_v1 = vmov 0.0   ;;  %vm244_vm1 = vcmask 1040384   ;;  %v2789_v32 = vlaneseq  ;;  %s1626_s17 = smov 35   ;;  %s1627_s19 = smov 51  }
  0x60   : > { %194 = vst [vmem:[#allocation4] sm:$0x3] %v1624_v1  ;;  %v209_v2 = vcombine.high %v196_v0, %v196_v0  ;;  %v212_v3 = vsel %vm211_vm0, %v196_v0, 0.0  ;;  %v230_v4 = vsel %vm211_vm0, %v196_v0, -inf  ;;  %195 = vst [vmem:[#allocation4 + $0x6] sm:$0x3] %v1624_v1 }
  0x61   : > { %v213_v5 = vrot.slane %v212_v3, 4  ;;  %v231_v6 = vrot.slane %v230_v4, 4  ;;  %v1625_v33 = vmov 1983009808   ;;  %v1830_v37 = vshrl.u32 %v2789_v32, 7  ;;  %s1628_s21 = smov 3  }
  0x62   : > { %v219_v7 = vsel %vm211_vm0, %v209_v2, 0.0  ;;  %v237_v8 = vsel %vm211_vm0, %v209_v2, -inf  ;;  %v300_v34 = vunpack.c.l.s4 %v1625_v33  ;;  %s1629_s30 = smov 19   ;;  %s1630_s3 = smov 115   ;;  %vm320_vm3 = vcmask 416768  }
  0x63   : > { %v214_v9 = vadd.f32 %v213_v5, %v212_v3  ;;  %v220_v10 = vrot.slane %v219_v7, 4  ;;  %v232_v11 = vmax.f32 %v230_v4, %v231_v6  ;;  %v238_v12 = vrot.slane %v237_v8, 4  ;;  %2862 = vst [vmem:[#allocation25_spill] sm:$0xff] %v1830_v37  ;;  %s1631_s25 = smov 99   ;;  %s1632_s7 = smov 83  }
  0x64   : > { %v301_v38 = vunpack.c.0.s8 %v300_v34  ;;  %s1833_s16 = sld [smem:[#allocation5 + $0x1]]  ;;  %s1835_s8 = sld [smem:[#allocation5 + $0x32]]  ;;  %vm264_vm2 = vcmp.eq.s32.totalorder %v1830_v37, 0  ;;  %vm340_vm4 = vcmask 285696   ;;  %vm360_vm5 = vcmask 154624  }
  0x65   : > { %v215_v13 = vrot.slane %v214_v9, 2  ;;  %v221_v14 = vadd.f32 %v220_v10, %v219_v7  ;;  %v233_v15 = vrot.slane %v232_v11, 2  ;;  %v239_v16 = vmax.f32 %v237_v8, %v238_v12  ;;  %s1837_s24 = sld [smem:[#allocation5]]  ;;  %s1839_s23 = sld [smem:[#allocation5 + $0x31]] }
  0x66   : > { %v304_v39 = vsub.s32 %v301_v38, %v1830_v37  ;;  %s1841_s27 = sld [smem:[#allocation5 + $0x2]]  ;;  %s1843_s28 = sld [smem:[#allocation5 + $0x33]]  ;;  %vm397_vm6 = vcmask 23552   ;;  %vm434_vm7 = vcmask 941056   ;;  %vm454_vm8 = vcmask 809984  }
  0x67   : > { %v216_v17 = vadd.f32 %v215_v13, %v214_v9  ;;  %v222_v18 = vrot.slane %v221_v14, 2  ;;  %v234_v19 = vmax.f32 %v232_v11, %v233_v15  ;;  %v240_v20 = vrot.slane %v239_v16, 2  ;;  %s1845_s29 = sld [smem:[#allocation5 + $0x3]]  ;;  %s1847_s5 = sld [smem:[#allocation5 + $0x34]] }
  0x68   : > { %s1849_s4 = sld [smem:[#allocation5 + $0x4]]  ;;  %s1851_s6 = sld [smem:[#allocation5 + $0x35]]  ;;  %vm474_vm9 = vcmask 678912   ;;  %vm600_vm10 = vcmask 1039360   ;;  %vm703_vm11 = vcmask 1031168  }
  0x69   : > { %v217_v21 = vrot.slane %v216_v17, 1  ;;  %v223_v22 = vadd.f32 %v222_v18, %v221_v14  ;;  %v235_v23 = vrot.slane %v234_v19, 1  ;;  %v241_v24 = vmax.f32 %v239_v16, %v240_v20  ;;  %s1867_s0 = sld [smem:[#allocation5 + $0x39]]  ;;  %s1871_s22 = sld [smem:[#allocation5 + $0x3a]] }
  0x6a   : > { %s1869_s1 = sld [smem:[#allocation5 + $0x9]]  ;;  %s1873_s13 = sld [smem:[#allocation5 + $0xa]]  ;;  %v497_v56 = vstv %s1833_s16  ;;  %v498_v57 = vstv %s1835_s8 }
  0x6b   : > { %v218_v25 = vadd.f32 %v217_v21, %v216_v17  ;;  %v224_v26 = vrot.slane %v223_v22, 1  ;;  %v236_v27 = vmax.f32 %v234_v19, %v235_v23  ;;  %v242_v28 = vrot.slane %v241_v24, 1  ;;  %s1875_s26 = sld [smem:[#allocation5 + $0x3b]]  ;;  %s1879_s10 = sld [smem:[#allocation5 + $0x3c]] }
  0x6c   : > { %s1877_s11 = sld [smem:[#allocation5 + $0xb]]  ;;  %s1881_s14 = sld [smem:[#allocation5 + $0xc]]  ;;  %v294_v58 = vstv %s1837_s24  ;;  %v295_v59 = vstv %s1839_s23  ;;  %v611_v60 = vstv %s1841_s27  ;;  %v612_v61 = vstv %s1843_s28 }
  0x6d   : > { %v225_v29 = vadd.f32 %v224_v26, %v223_v22  ;;  %v243_v30 = vmax.f32 %v241_v24, %v242_v28  ;;  %v245_v31 = vsel %vm244_vm1, %v218_v25, %v236_v27  ;;  %s1883_s20 = sld [smem:[#allocation5 + $0x3d]]  ;;  %s1887_s2 = sld [smem:[#allocation5 + $0x3e]]  ;;  %v714_v62 = vstv %s1845_s29 }
  0x6e   : > { %s1885_s9 = sld [smem:[#allocation5 + $0xd]]  ;;  %s1889_s15 = sld [smem:[#allocation5 + $0xe]]  ;;  %v715_v63 = vstv %s1847_s5  ;;  %v807_v0 = vstv %s1849_s4  ;;  %v808_v1 = vstv %s1851_s6  ;;  %v1962_v10 = vsel %vm264_vm2, %v294_v58, %v295_v59 }
  0x6f   : > { %v246_v35 = vsel %vm244_vm1, %v225_v29, %v243_v30  ;;  %s1891_s12 = sld [smem:[#allocation5 + $0x3f]]  ;;  %s1893_s18 = sld [smem:[#allocation5 + $0x15]]  ;;  %v510_v9 = vstv %s1867_s0  ;;  %2882 = vst [vmem:[#allocation45_spill] sm:$0xff] %v1962_v10  ;;  %v1966_v11 = vsel %vm264_vm2, %v497_v56, %v498_v57  ;;  %v623_v13 = vstv %s1871_s22 }
  0x70   : > { %v249_v36 = vcombine.low %v245_v31, %v246_v35  ;;  %s1940_s16 = sld [smem:[#allocation5 + $0x25]]  ;;  %s1942_s8 = sld [smem:[#allocation5 + $0x56]]  ;;  %v622_v12 = vstv %s1869_s1  ;;  %v1976_v14 = vsel %vm264_vm2, %v611_v60, %v612_v61  ;;  %v1980_v15 = vsel %vm264_vm2, %v714_v62, %v715_v63 }
  0x71   : > { %2863 = sst [smem:[#allocation26_spill]] %s1875_s26  ;;  %s1895_s26 = sld [smem:[#allocation5 + $0x46]]  ;;  %v1984_v16 = vsel %vm264_vm2, %v807_v0, %v808_v1  ;;  %v725_v21 = vstv %s1873_s13  ;;  %v2013_v22 = vsel %vm264_vm2, %v622_v12, %v623_v13 }
  0x72   : > { %1284 = vst.sshfl [vmem:[#allocation4 + $0x2] sm:$0x33 pattern:$0x76325410] %v249_v36  ;;  %2864 = sst [smem:[#allocation27_spill]] %s1877_s11  ;;  %s1897_s11 = sld [smem:[#allocation5 + $0x16]]  ;;  %v921_v26 = vstv %s1881_s14 }
  0x73   : > { %2865 = sst [smem:[#allocation28_spill]] %s1879_s10  ;;  %s1899_s10 = sld [smem:[#allocation5 + $0x47]]  ;;  %2888 = vst [vmem:[#allocation46_spill] sm:$0xff] %v1984_v16 }
  0x74   : > { %2866 = sst [smem:[#allocation29_spill]] %s1883_s20  ;;  %s1901_s20 = sld [smem:[#allocation5 + $0x17]] }
  0x75   : > { %2867 = sst [smem:[#allocation30_spill]] %s1885_s9  ;;  %s1903_s9 = sld [smem:[#allocation5 + $0x48]] }
  0x76   : > { %2868 = sst [smem:[#allocation31_spill]] %s1887_s2  ;;  %s1911_s2 = sld [smem:[#allocation5 + $0x4a]]  ;;  %v666_v62 = vstv %s1940_s16  ;;  %v667_v63 = vstv %s1942_s8 }
  0x77   : > { %2869 = sst [smem:[#allocation32_spill]] %s1889_s15  ;;  %s1905_s15 = sld [smem:[#allocation5 + $0x18]]  ;;  %v372_v34 = vstv %s1895_s26 }
  0x78   : > { %2870 = sst [smem:[#allocation33_spill]] %s1891_s12  ;;  %s1907_s12 = sld [smem:[#allocation5 + $0x49]] }
  0x79   : > { %v259_v40 = vld [vmem:[#allocation4] sm:$0x3f]  ;;  %2871 = sst [smem:[#allocation34_spill]] %s1893_s18  ;;  %s1909_s18 = sld [smem:[#allocation5 + $0x19]] }
  0x7a   : > { %v260_v41 = vld [vmem:[#allocation4] sm:$0xff]  ;;  %v305_v42 = vrot.slane %v259_v40, %v304_v39  ;;  %v298_v46 = vcombine.high %v259_v40, %v259_v40  ;;  %2872 = sst [smem:[#allocation35_spill]] %s1897_s11  ;;  %s1913_s11 = sld [smem:[#allocation5 + $0x1a]] }
  0x7b   : > { %v382_v43 = vrot.slane %v260_v41, %v304_v39  ;;  %v261_v44 = vld [vmem:[#allocation4 + $0x2] sm:$0x3f]  ;;  %v375_v49 = vcombine.high %v260_v41, %v260_v41  ;;  %2873 = sst [smem:[#allocation36_spill]] %s1899_s10  ;;  %s1915_s10 = sld [smem:[#allocation5 + $0x4b]] }
  0x7c   : > { %334 = vrot.lane.b32.xlu1 %v305_v42, %s1626_s17  ;;  %314 = vrot.lane.b32.xlu0 %v305_v42, %s1627_s19  ;;  %v419_v45 = vrot.slane %v261_v44, %v304_v39  ;;  %v313_v47 = vcombine.high %v305_v42, %v305_v42  ;;  %v312_v48 = vrot.slane %v298_v46, %v304_v39  ;;  %2874 = sst [smem:[#allocation37_spill]] %s1901_s20  ;;  %s1917_s20 = sld [smem:[#allocation5 + $0x1b]] }
  0x7d   : > { %v390_v50 = vcombine.high %v382_v43, %v382_v43  ;;  %v389_v51 = vrot.slane %v375_v49, %v304_v39  ;;  %v412_v52 = vcombine.high %v261_v44, %v261_v44  ;;  %2875 = sst [smem:[#allocation38_spill]] %s1903_s9  ;;  %s1919_s9 = sld [smem:[#allocation5 + $0x4c]]  ;;  %v747_v40 = vstv %s1905_s15 }
  0x7e   : > { %v427_v53 = vcombine.high %v419_v45, %v419_v45  ;;  %2877 = sst [smem:[#allocation40_spill]] %s1911_s2  ;;  %s1948_s24 = sld [smem:[#allocation5 + $0xf]]  ;;  %v748_v41 = vstv %s1907_s12 }
  0x7f   : > { %v426_v54 = vrot.slane %v412_v52, %v304_v39  ;;  %v536_v55 = vcombine.high %v389_v51, %v389_v51  ;;  %2876 = sst [smem:[#allocation39_spill]] %s1909_s18  ;;  %s1926_s2 = sld [smem:[#allocation5 + $0x41]]  ;;  %v2096_v52 = vsel %vm264_vm2, %v747_v40, %v748_v41 }
  0x80   : > { %391 = vrot.lane.b32.xlu1 %v382_v43, %s1628_s21  ;;  %354 = vrot.lane.b32.xlu0 %v305_v42, %s1629_s30  ;;  %s1924_s18 = sld [smem:[#allocation5 + $0x10]]  ;;  %s1956_s27 = sld [smem:[#allocation5 + $0x1d]] }
  0x81   : > { %s1950_s23 = sld [smem:[#allocation5 + $0x40]]  ;;  %s1958_s28 = sld [smem:[#allocation5 + $0x4e]] }
  0x82   : > { %2878 = sst [smem:[#allocation41_spill]] %s1917_s20  ;;  %s1932_s20 = sld [smem:[#allocation5 + $0x1e]] }
  0x83   : > { %2879 = sst [smem:[#allocation42_spill]] %s1919_s9  ;;  %s1934_s9 = sld [smem:[#allocation5 + $0x4f]] }
  0x84   : > { %428 = vrot.lane.b32.xlu1 %v419_v45, %s1630_s3  ;;  %448 = vrot.lane.b32.xlu0 %v419_v45, %s1631_s25  ;;  %s2883_s29 = sld [smem:[#allocation26_spill]]  ;;  %s1970_s5 = sld [smem:[#allocation5 + $0x24]]  ;;  %v521_v0 = vstv %s1948_s24 }
  0x85   : > { %s2885_s4 = sld [smem:[#allocation27_spill]]  ;;  %s1972_s0 = sld [smem:[#allocation5 + $0x55]]  ;;  %v634_v59 = vstv %s1926_s2 }
  0x86   : > { %2880 = sst [smem:[#allocation43_spill]] %s1956_s27  ;;  %s2887_s6 = sld [smem:[#allocation28_spill]]  ;;  %v633_v58 = vstv %s1924_s18 }
  0x87   : > { %2881 = sst [smem:[#allocation44_spill]] %s1958_s28  ;;  %s2890_s1 = sld [smem:[#allocation29_spill]]  ;;  %v522_v1 = vstv %s1950_s23 }
  0x88   : > { %316 = vrot.lane.b32.xlu0 %v313_v47, %s1627_s19  ;;  %318 = vrot.lane.b32.xlu1 %v312_v48, %s1627_s19  ;;  %s1855_s19 = sld [smem:[#allocation5 + $0x36]]  ;;  %s1990_s22 = sld [smem:[#allocation5 + $0x12]]  ;;  %v655_v60 = vstv %s1932_s20 }
  0x89   : > { %s2904_s28 = sld [smem:[#allocation37_spill]]  ;;  %s2020_s13 = sld [smem:[#allocation5 + $0x5d]]  ;;  %v656_v61 = vstv %s1934_s9 }
  0x8a   : > { %2884 = sst [smem:[#allocation26_spill]] %s1970_s5  ;;  %v726_v23 = vstv %s2883_s29  ;;  %s2018_s5 = sld [smem:[#allocation5 + $0x2c]] }
  0x8b   : > { %2886 = sst [smem:[#allocation27_spill]] %s1972_s0  ;;  %v818_v24 = vstv %s2885_s4  ;;  %s2903_s0 = sld [smem:[#allocation36_spill]]  ;;  %v2056_v44 = vsel %vm264_vm2, %v725_v21, %v726_v23  ;;  %v2156_v21 = vsel %vm264_vm2, %v633_v58, %v634_v59  ;;  %v2160_v23 = vsel %vm264_vm2, %v655_v60, %v656_v61 }
  0x8c   : > { %336 = vrot.lane.b32.xlu0 %v313_v47, %s1626_s17  ;;  %338 = vrot.lane.b32.xlu1 %v312_v48, %s1626_s17  ;;  %s1853_s17 = sld [smem:[#allocation5 + $0x5]]  ;;  %v819_v25 = vstv %s2887_s6  ;;  %s2906_s27 = sld [smem:[#allocation38_spill]] }
  0x8d   : > { %v922_v27 = vstv %s2890_s1  ;;  %s2028_s29 = sld [smem:[#allocation5 + $0x5c]]  ;;  %s2908_s4 = sld [smem:[#allocation40_spill]] }
  0x8e   : > { %v911_v3 = vstv %s1855_s19  ;;  %2891 = sst [smem:[#allocation28_spill]] %s1990_s22  ;;  %s1992_s19 = sld [smem:[#allocation5 + $0x43]]  ;;  %v2064_v46 = vsel %vm264_vm2, %v921_v26, %v922_v27 }
  0x8f   : > { %s2902_s22 = sld [smem:[#allocation35_spill]]  ;;  %s2034_s6 = sld [smem:[#allocation5 + $0x27]]  ;;  %v644_v38 = vstv %s2904_s28  ;;  %2910 = vst [vmem:[#allocation51_spill] sm:$0xff] %v2064_v46 }
  0x90   : > { %358 = vrot.lane.b32.xlu0 %v312_v48, %s1629_s30  ;;  %356 = vrot.lane.b32.xlu1 %v313_v47, %s1629_s30  ;;  %s1859_s30 = sld [smem:[#allocation5 + $0x37]]  ;;  %s2042_s14 = sld [smem:[#allocation5 + $0x2e]]  ;;  %v677_v26 = vstv %s2018_s5 }
  0x91   : > { %v534_v36 = vstv %s2903_s0  ;;  %s2044_s1 = sld [smem:[#allocation5 + $0x5f]]  ;;  %s2052_s26 = sld [smem:[#allocation5 + $0x42]] }
  0x92   : > { %v910_v2 = vstv %s1853_s17  ;;  %s2892_s17 = sld [smem:[#allocation30_spill]]  ;;  %v645_v39 = vstv %s2906_s27  ;;  %s2911_s12 = sld [smem:[#allocation41_spill]] }
  0x93   : > { %v1988_v17 = vsel %vm264_vm2, %v910_v2, %v911_v3  ;;  %v841_v43 = vstv %s2908_s4  ;;  %s2913_s15 = sld [smem:[#allocation42_spill]]  ;;  %s2070_s27 = sld [smem:[#allocation5 + $0x1f]] }
  0x94   : > { %393 = vrot.lane.b32.xlu0 %v390_v50, %s1628_s21  ;;  %395 = vrot.lane.b32.xlu1 %v389_v51, %s1628_s21  ;;  %2889 = vst [vmem:[#allocation47_spill] sm:$0xff] %v1988_v17  ;;  %2893 = sst [smem:[#allocation29_spill]] %s1992_s19  ;;  %s2009_s19 = sld [smem:[#allocation5 + $0x51]]  ;;  %v2088_v51 = vsel %vm264_vm2, %v644_v38, %v645_v39 }
  0x95   : > { %v533_v35 = vstv %s2902_s22  ;;  %s2072_s28 = sld [smem:[#allocation5 + $0x50]]  ;;  %s2090_s0 = sld [smem:[#allocation5 + $0x26]]  ;;  %v862_v38 = vstv %s2034_s6 }
  0x96   : > { %v1014_v5 = vstv %s1859_s30  ;;  %s2897_s30 = sld [smem:[#allocation32_spill]]  ;;  %v2084_v50 = vsel %vm264_vm2, %v533_v35, %v534_v36  ;;  %s2092_s22 = sld [smem:[#allocation5 + $0x57]]  ;;  %v574_v35 = vstv %s2028_s29  ;;  %v873_v40 = vstv %s2042_s14 }
  0x97   : > { %2905 = sst [smem:[#allocation32_spill]] %s2020_s13  ;;  %s2036_s13 = sld [smem:[#allocation5 + $0x58]]  ;;  %v874_v41 = vstv %s2044_s1 }
  0x98   : > { %430 = vrot.lane.b32.xlu0 %v427_v53, %s1630_s3  ;;  %432 = vrot.lane.b32.xlu1 %v426_v54, %s1630_s3  ;;  %s1861_s3 = sld [smem:[#allocation5 + $0x7]]  ;;  %v1024_v28 = vstv %s2892_s17  ;;  %s2050_s17 = sld [smem:[#allocation5 + $0x11]]  ;;  %v1046_v56 = vstv %s2911_s12 }
  0x99   : > { %v1047_v57 = vstv %s2913_s15  ;;  %s2924_s4 = sld [smem:[#allocation27_spill]]  ;;  %s2128_s2 = sld [smem:[#allocation5 + $0x28]] }
  0x9a   : > { %s2130_s18 = sld [smem:[#allocation5 + $0x59]]  ;;  %s2136_s9 = sld [smem:[#allocation5 + $0x2f]] }
  0x9b   : > { %s2138_s20 = sld [smem:[#allocation5 + $0x60]]  ;;  %s2150_s16 = sld [smem:[#allocation5 + $0x14]] }
  0x9c   : > { %537 = vrot.lane.b32.xlu0 %v536_v55, %s1628_s21  ;;  %450 = vrot.lane.b32.xlu1 %v427_v53, %s1631_s25  ;;  %s1857_s21 = sld [smem:[#allocation5 + $0x6]]  ;;  %v351_v30 = vstv %s2897_s30  ;;  %2917 = sst [smem:[#allocation35_spill]] %s2092_s22  ;;  %v944_v55 = vstv %s1915_s10 }
  0x9d   : > { %s2920_s30 = sld [smem:[#allocation43_spill]]  ;;  %s2112_s22 = sld [smem:[#allocation5 + $0x13]]  ;;  %v863_v39 = vstv %s2036_s13 }
  0x9e   : > { %v331_v6 = vstv %s1861_s3  ;;  %s2898_s3 = sld [smem:[#allocation33_spill]]  ;;  %s2120_s10 = sld [smem:[#allocation5 + $0x21]] }
  0x9f   : > { %2914 = sst [smem:[#allocation33_spill]] %s2072_s28  ;;  %s2114_s28 = sld [smem:[#allocation5 + $0x44]] }
  0xa0   : > { %452 = vrot.lane.b32.xlu0 %v426_v54, %s1631_s25  ;;  %468 = vrot.lane.b32.xlu1 %v419_v45, %s1632_s7  ;;  %s1863_s25 = sld [smem:[#allocation5 + $0x38]]  ;;  %v2060_v45 = vsel %vm264_vm2, %v818_v24, %v819_v25  ;;  %s2931_s8 = sld [smem:[#allocation32_spill]]  ;;  %v2164_v24 = vsel %vm264_vm2, %v666_v62, %v667_v63  ;;  %v2168_v25 = vsel %vm264_vm2, %v521_v0, %v522_v1 }
  0xa1   : > { %2909 = vst [vmem:[#allocation50_spill] sm:$0xff] %v2060_v45  ;;  %s2152_s24 = sld [smem:[#allocation5 + $0x45]]  ;;  %s2170_s23 = sld [smem:[#allocation5 + $0x22]] }
  0xa2   : > { %v1013_v4 = vstv %s1857_s21  ;;  %s2894_s21 = sld [smem:[#allocation31_spill]]  ;;  %s2172_s15 = sld [smem:[#allocation5 + $0x53]] }
  0xa3   : > { %v1996_v18 = vsel %vm264_vm2, %v1013_v4, %v1014_v5  ;;  %2901 = sst [smem:[#allocation31_spill]] %s2009_s19  ;;  %s2026_s19 = sld [smem:[#allocation5 + $0x2b]]  ;;  %v549_v2 = vstv %s2920_s30  ;;  %v562_v5 = vstv %s2924_s4  ;;  %v932_v62 = vstv %s2112_s22 }
  0xa4   : > { %470 = vrot.lane.b32.xlu0 %v427_v53, %s1632_s7  ;;  %472 = vrot.lane.b32.xlu1 %v426_v54, %s1632_s7  ;;  %s1865_s7 = sld [smem:[#allocation5 + $0x8]]  ;;  %2895 = vst [vmem:[#allocation48_spill] sm:$0xff] %v1996_v18  ;;  %v352_v31 = vstv %s2898_s3  ;;  %v943_v54 = vstv %s1913_s11  ;;  %s2106_s3 = sld [smem:[#allocation5 + $0x5e]] }
  0xa5   : > { %v2076_v48 = vsel %vm264_vm2, %v351_v30, %v352_v31  ;;  %s2926_s11 = sld [smem:[#allocation29_spill]]  ;;  %s2928_s12 = sld [smem:[#allocation31_spill]]  ;;  %v933_v63 = vstv %s2114_s28  ;;  %v954_v0 = vstv %s2120_s10 }
  0xa6   : > { %v332_v7 = vstv %s1863_s25  ;;  %s2007_s25 = sld [smem:[#allocation5 + $0x20]]  ;;  %s2189_s30 = sld [smem:[#allocation5 + $0x5a]] }
  0xa7   : > { %v2000_v19 = vsel %vm264_vm2, %v331_v6, %v332_v7  ;;  %s2934_s5 = sld [smem:[#allocation33_spill]]  ;;  %s2204_s4 = sld [smem:[#allocation5 + $0x61]] }
  0xa8   : > { %2896 = vst [vmem:[#allocation49_spill] sm:$0xff] %v2000_v19  ;;  %v1025_v29 = vstv %s2894_s21  ;;  %s2104_s21 = sld [smem:[#allocation5 + $0x2d]]  ;;  %s2218_s29 = sld [smem:[#allocation5 + $0x23]] }
  0xa9   : > { %v2068_v47 = vsel %vm264_vm2, %v1024_v28, %v1025_v29  ;;  %s2220_s6 = sld [smem:[#allocation5 + $0x54]]  ;;  %s2226_s13 = sld [smem:[#allocation5 + $0x2a]] }
  0xaa   : > { %v509_v8 = vstv %s1865_s7  ;;  %s2900_s7 = sld [smem:[#allocation34_spill]]  ;;  %2912 = vst [vmem:[#allocation52_spill] sm:$0xff] %v2068_v47  ;;  %2921 = sst [smem:[#allocation37_spill]] %s2106_s3 }
  0xab   : > { %v2004_v20 = vsel %vm264_vm2, %v509_v8, %v510_v9  ;;  %2916 = sst [smem:[#allocation34_spill]] %s2090_s0  ;;  %s2925_s0 = sld [smem:[#allocation28_spill]]  ;;  %v830_v7 = vstv %s2926_s11  ;;  %v2142_v8 = vsel %vm264_vm2, %v943_v54, %v944_v55  ;;  %v2146_v9 = vsel %vm264_vm2, %v1046_v56, %v1047_v57 }
  0xac   : > { %2899 = sst [smem:[#allocation30_spill]] %s2007_s25  ;;  %s2907_s25 = sld [smem:[#allocation39_spill]]  ;;  %2929 = vst [vmem:[#allocation55_spill] sm:$0xff] %v2142_v8  ;;  %2930 = vst [vmem:[#allocation56_spill] sm:$0xff] %v2146_v9  ;;  %v852_v13 = vstv %s2928_s12  ;;  %v758_v54 = vstv %s2070_s27 }
  0xad   : > { %s2927_s3 = sld [smem:[#allocation30_spill]]  ;;  %s2939_s12 = sld [smem:[#allocation37_spill]]  ;;  %v759_v55 = vstv %s2934_s5 }
  0xae   : > { %2919 = sst [smem:[#allocation36_spill]] %s2104_s21  ;;  %s2122_s21 = sld [smem:[#allocation5 + $0x52]] }
  0xaf   : > { %s2938_s11 = sld [smem:[#allocation36_spill]]  ;;  %s2228_s14 = sld [smem:[#allocation5 + $0x5b]]  ;;  %v465_v32 = vstv %s2226_s13 }
  0xb0   : > { %v371_v33 = vstv %s2900_s7  ;;  %s2923_s7 = sld [smem:[#allocation26_spill]]  ;;  %s1633_s1 = smov 126  }
  0xb1   : > { %v2080_v49 = vsel %vm264_vm2, %v371_v33, %v372_v34  ;;  %v829_v6 = vstv %s2925_s0  ;;  %s2187_s0 = sld [smem:[#allocation5 + $0x29]]  ;;  %v678_v33 = vstv %s2931_s8  ;;  %v573_v34 = vstv %s2026_s19  ;;  %s2210_s8 = sld [smem:[#allocation5 + $0x1c]] }
  0xb2   : > { %v840_v42 = vstv %s2907_s25  ;;  %2915 = vst [vmem:[#allocation53_spill] sm:$0xff] %v2080_v49  ;;  %s2922_s25 = sld [smem:[#allocation44_spill]]  ;;  %v2185_v29 = vsel %vm264_vm2, %v829_v6, %v830_v7  ;;  %v2260_v7 = vsel %vm264_vm2, %v758_v54, %v759_v55  ;;  %v1057_v54 = vstv %s2170_s23  ;;  %s1636_s27 = smov 125  }
  0xb3   : > { %v2100_v53 = vsel %vm264_vm2, %v840_v42, %v841_v43  ;;  %v851_v12 = vstv %s2927_s3  ;;  %2933 = vst [vmem:[#allocation58_spill] sm:$0xff] %v2185_v29  ;;  %s2936_s3 = sld [smem:[#allocation34_spill]]  ;;  %s2212_s19 = sld [smem:[#allocation5 + $0x4d]]  ;;  %v736_v42 = vstv %s2050_s17  ;;  %v737_v43 = vstv %s2052_s26 }
  0xb4   : > { %2918 = vst [vmem:[#allocation54_spill] sm:$0xff] %v2100_v53  ;;  %v2200_v36 = vsel %vm264_vm2, %v851_v12, %v852_v13  ;;  %v781_v59 = vstv %s2939_s12  ;;  %v955_v1 = vstv %s2122_s21  ;;  %v2256_v6 = vsel %vm264_vm2, %v736_v42, %v737_v43  ;;  %s1634_s17 = smov 127   ;;  %s1635_s26 = smov 124  }
  0xb5   : > { %2935 = vst [vmem:[#allocation59_spill] sm:$0xff] %v2200_v36  ;;  %v780_v58 = vstv %s2938_s11  ;;  %v1035_v42 = vstv %s2150_s16  ;;  %v1036_v43 = vstv %s2152_s24  ;;  %v1058_v55 = vstv %s2172_s15  ;;  %s1637_s28 = smov 123   ;;  %s1638_s22 = smov 122  }
  0xb6   : > { %v561_v4 = vstv %s2923_s7  ;;  %s2937_s7 = sld [smem:[#allocation35_spill]]  ;;  %v2268_v13 = vsel %vm264_vm2, %v780_v58, %v781_v59  ;;  %v1080_v59 = vstv %s2204_s4  ;;  %v466_v49 = vstv %s2228_s14  ;;  %s3015_s21 = sld [smem:[#allocation24_spill]] }
  0xb7   : > { %v2181_v28 = vsel %vm264_vm2, %v561_v4, %v562_v5  ;;  %v2248_v4 = vsel %vm264_vm2, %v862_v38, %v863_v39  ;;  %v2252_v5 = vsel %vm264_vm2, %v873_v40, %v874_v41  ;;  %2945 = vst [vmem:[#allocation65_spill] sm:$0xff] %v2268_v13  ;;  %v976_v40 = vstv %s2136_s9  ;;  %s3016_s10 = sld [smem:[#allocation17_spill]]  ;;  %s3019_s15 = sld [smem:[#allocation91_spill]] }
  0xb8   : > { %v550_v3 = vstv %s2922_s25  ;;  %2932 = vst [vmem:[#allocation57_spill] sm:$0xff] %v2181_v28  ;;  %s2202_s25 = sld [smem:[#allocation5 + $0x30]]  ;;  %2942 = vst [vmem:[#allocation62_spill] sm:$0xff] %v2248_v4  ;;  %v977_v41 = vstv %s2138_s20 }
  0xb9   : > { %v2177_v27 = vsel %vm264_vm2, %v549_v2, %v550_v3  ;;  %v769_v56 = vstv %s2936_s3  ;;  %v2240_v2 = vsel %vm264_vm2, %v677_v26, %v678_v33  ;;  %v2244_v3 = vsel %vm264_vm2, %v573_v34, %v574_v35  ;;  %2943 = vst [vmem:[#allocation63_spill] sm:$0xff] %v2252_v5  ;;  %s1640_s3 = smov [#allocation10]  }
  0xba   : > { %2940 = vst [vmem:[#allocation60_spill] sm:$0xff] %v2240_v2  ;;  %2941 = vst [vmem:[#allocation61_spill] sm:$0xff] %v2244_v3  ;;  %v2272_v26 = vsel %vm264_vm2, %v932_v62, %v933_v63  ;;  %v2276_v33 = vsel %vm264_vm2, %v954_v0, %v955_v1  ;;  %v965_v34 = vstv %s2128_s2  ;;  %v966_v35 = vstv %s2130_s18  ;;  %s3018_s18 = sld [smem:[#allocation22_spill]] }
  0xbb   : > { %2946 = vst [vmem:[#allocation66_spill] sm:$0xff] %v2272_v26  ;;  %2947 = vst [vmem:[#allocation67_spill] sm:$0xff] %v2276_v33  ;;  %v408_v62 = vstv %s2210_s8  ;;  %v409_v63 = vstv %s2212_s19  ;;  %v445_v0 = vstv %s2218_s29  ;;  %v446_v1 = vstv %s2220_s6 }
  0xbc   : > { %v770_v57 = vstv %s2937_s7  ;;  %v2302_v5 = vsel %vm264_vm2, %v965_v34, %v966_v35  ;;  %v2306_v3 = vsel %vm264_vm2, %v976_v40, %v977_v41  ;;  %v2310_v2 = vsel %vm264_vm2, %v1035_v42, %v1036_v43  ;;  %s1283_s2 = sshll.u32 %s3015_s21, 1 }
  0xbd   : > { %v2264_v12 = vsel %vm264_vm2, %v769_v56, %v770_v57  ;;  %v1068_v56 = vstv %s2187_s0  ;;  %v1069_v57 = vstv %s2189_s30  ;;  %2948 = vst [vmem:[#allocation68_spill] sm:$0xff] %v2302_v5  ;;  %2949 = vst [vmem:[#allocation69_spill] sm:$0xff] %v2310_v2  ;;  %v2328_v35 = vsel %vm264_vm2, %v408_v62, %v409_v63  ;;  %s1390_s9 = sshll.u32 %s3016_s10, 5  ;;  %s187_s20 = scalar_lea.vmem [#allocation10], %s1283_s2 }
  0xbe   : > { %2944 = vst [vmem:[#allocation64_spill] sm:$0xff] %v2264_v12  ;;  %v1079_v58 = vstv %s2202_s25  ;;  %v2314_v12 = vsel %vm264_vm2, %v1057_v54, %v1058_v55  ;;  %v2320_v28 = vsel %vm264_vm2, %v1068_v56, %v1069_v57  ;;  %2953 = vst [vmem:[#allocation73_spill] sm:$0xff] %v2328_v35  ;;  %v2340_v42 = vsel %vm264_vm2, %v465_v32, %v466_v49  ;;  %s1179_s16 = sshll.u32 %s187_s20, 4  ;;  %s2720_s0 = scalar_lea.hbm %s3019_s15, %s1390_s9  ;;  %s2722_s16 = int_to_ptr.vmem [resolvable:$true] %s1179_s16 }
  0xbf   : > { %2950 = vst [vmem:[#allocation70_spill] sm:$0xff] %v2314_v12  ;;  %2951 = vst [vmem:[#allocation71_spill] sm:$0xff] %v2320_v28  ;;  %v2324_v34 = vsel %vm264_vm2, %v1079_v58, %v1080_v59  ;;  %s1165_s30 = scalar_lea.sflag [#allocation7], %s3015_s21  ;;  %s1534_s5 = scalar_lea.vmem %s2722_s16, 32 }
  0xc0   : > { %2952 = vst [vmem:[#allocation72_spill] sm:$0xff] %v2324_v34  ;;  %2955 = vst [vmem:[#allocation75_spill] sm:$0xff] %v2340_v42  ;;  %p1535_p4 = scmp.ne.s32.totalorder %s2722_s16, %s1534_s5  ;;  %p3020_p8 = scmp.ne.s32.totalorder %s3018_s18, 0 }
  0xc1   : > { %s1538_s25 = sshll.u32 %s1640_s3, 4  ;;  %s1539_s25 = int_to_ptr.vmem [resolvable:$false] %s1538_s25 }
  0xc2   : > { %p1536_p2 = pnand %p1535_p4, %p3020_p8  ;;  %s1540_s7 = scalar_lea.vmem %s1539_s25, 64 }
  0xc3   : > { %p1541_p0 = scmp.lt.s32.totalorder %s2722_s16, %s1539_s25  ;;  %p1542_p3 = scmp.lt.s32.totalorder %s1540_s7, %s1534_s5 }
  0xc4   : > { %p1537_p12 = pneg %p1536_p2 }
  0xc5   : > { %p1543_p5 = por %p1542_p3, %p1541_p0 }
  0xc7   : > { %p1544_p11 = pnand %p1543_p5, %p1537_p12 }
  0xee   : > { %v2191_v30 = vpop.permute.xlu1 %334  ;;  %v2193_v31 = vpop.permute.xlu0 %314 }
  0xf2   : > { %v2230_v60 = vpop.permute.xlu1 %391  ;;  %v2232_v61 = vpop.permute.xlu0 %354 }
  0xf6   : > { %v2280_v38 = vpop.permute.xlu1 %428  ;;  %v2282_v39 = vpop.permute.xlu0 %448 }
  0xfa   : > { %v317_v9 = vpop.permute.xlu0 %316  ;;  %v319_v13 = vpop.permute.xlu1 %318 }
  0xfb   : > { %v321_v4 = vsel %vm320_vm3, %v2193_v31, %v317_v9  ;;  %v2331_v40 = vsel %vm320_vm3, %v317_v9, %v319_v13  ;;  %v503_v41 = vmul.f32 %v1966_v11, %v319_v13  ;;  %v2336_v31 = vsel %vm264_vm2, %v445_v0, %v446_v1 }
  0xfc   : > { %2954 = vst [vmem:[#allocation74_spill] sm:$0xff] %v2336_v31  ;;  %v325_v43 = vmul.f32 %v321_v4, %v1962_v10  ;;  %v2344_v54 = vmul.f32 %v1966_v11, %v321_v4  ;;  %v2347_v55 = vmul.f32 %v1976_v14, %v321_v4  ;;  %v616_v9 = vmul.f32 %v1976_v14, %v319_v13 }
  0xfd   : > { %v2351_v56 = vmul.f32 %v1980_v15, %v321_v4  ;;  %v2354_v57 = vmul.f32 %v1984_v16, %v321_v4  ;;  %v2357_v58 = vmul.f32 %v1988_v17, %v321_v4  ;;  %v2360_v32 = vmul.f32 %v1996_v18, %v321_v4 }
  0xfe   : > { %v337_v49 = vpop.permute.xlu0 %336  ;;  %v339_v59 = vpop.permute.xlu1 %338  ;;  %v719_v62 = vmul.f32 %v1980_v15, %v319_v13  ;;  %v812_v63 = vmul.f32 %v1984_v16, %v319_v13  ;;  %v915_v0 = vmul.f32 %v1988_v17, %v319_v13  ;;  %v2368_v37 = vmul.f32 %v1996_v18, %v319_v13 }
  0xff   : > { %2956 = vst [vmem:[#allocation76_spill] sm:$0xff] %v2357_v58  ;;  %2957 = vst [vmem:[#allocation77_spill] sm:$0xff] %v2360_v32  ;;  %v341_v1 = vsel %vm340_vm4, %v2191_v30, %v337_v49  ;;  %v2372_v31 = vsel %vm340_vm4, %v337_v49, %v339_v59  ;;  %v502_v4 = vmul.f32 %v1966_v11, %v2331_v40  ;;  %vm899_vm2 = vcmask 1014784  }
 0x100   : > { %2958 = vst [vmem:[#allocation78_spill] sm:$0xff] %v2368_v37  ;;  %v345_v42 = vmul.f32 %v341_v1, %v2000_v19  ;;  %v513_v35 = vmul.f32 %v2004_v20, %v341_v1  ;;  %v625_v10 = vmul.f32 %v2013_v22, %v341_v1  ;;  %v515_v34 = vmul.f32 %v2004_v20, %v339_v59 }
 0x101   : > { %v627_v30 = vmul.f32 %v2013_v22, %v339_v59  ;;  %v2383_v13 = vmul.f32 %v2056_v44, %v341_v1  ;;  %v2386_v49 = vmul.f32 %v2060_v45, %v341_v1  ;;  %v823_v19 = vmul.f32 %v2060_v45, %v339_v59 }
 0x102   : > { %v2380_v28 = vadd.f32 %v345_v42, %v325_v43  ;;  %v2389_v37 = vpop.permute.xlu0 %358  ;;  %v357_v11 = vpop.permute.xlu1 %356  ;;  %v2392_v18 = vmul.f32 %v2064_v46, %v341_v1  ;;  %v730_v12 = vmul.f32 %v2056_v44, %v339_v59  ;;  %v926_v2 = vmul.f32 %v2064_v46, %v339_v59 }
 0x103   : > { %2960 = vst [vmem:[#allocation80_spill] sm:$0xff] %v2389_v37  ;;  %v2398_v42 = vsel %vm360_vm5, %v2232_v61, %v357_v11  ;;  %v2401_v43 = vmul.f32 %v2068_v47, %v341_v1  ;;  %v638_v32 = vmul.f32 %v2156_v21, %v2389_v37  ;;  %v2412_v58 = vsel %vm360_vm5, %v357_v11, %v2389_v37 }
 0x104   : > { %2959 = vst [vmem:[#allocation79_spill] sm:$0xff] %v2380_v28  ;;  %2961 = vst [vmem:[#allocation81_spill] sm:$0xff] %v2392_v18  ;;  %v2404_v28 = vmul.f32 %v2068_v47, %v339_v59  ;;  %v527_v18 = vmul.f32 %v2168_v25, %v2389_v37  ;;  %v2416_v61 = vmul.f32 %v2398_v42, %v2076_v48  ;;  %vm798_vm3 = vcmask 1022976  }
 0x105   : > { %2962 = vst [vmem:[#allocation82_spill] sm:$0xff] %v2401_v43  ;;  %v630_v46 = vadd.f32 %v627_v30, %v616_v9  ;;  %v834_v1 = vmul.f32 %v2185_v29, %v2389_v37  ;;  %v518_v47 = vadd.f32 %v515_v34, %v503_v41  ;;  %v826_v43 = vadd.f32 %v823_v19, %v812_v63 }
 0x106   : > { %2963 = vst [vmem:[#allocation83_spill] sm:$0xff] %v2404_v28  ;;  %2964 = vst [vmem:[#allocation84_spill] sm:$0xff] %v2416_v61  ;;  %v394_v59 = vpop.permute.xlu0 %393  ;;  %v396_v28 = vpop.permute.xlu1 %395  ;;  %v741_v17 = vmul.f32 %v2256_v6, %v2389_v37  ;;  %v937_v11 = vmul.f32 %v2272_v26, %v2389_v37  ;;  %v733_v16 = vadd.f32 %v730_v12, %v719_v62 }
 0x107   : > { %v2425_v45 = vsel %vm397_vm6, %v394_v59, %v396_v28  ;;  %v929_v61 = vadd.f32 %v926_v2, %v915_v0  ;;  %v514_v9 = vmul.f32 %v2004_v20, %v2372_v31  ;;  %v2431_v30 = vmul.f32 %v2412_v58, %v2076_v48 }
 0x108   : > { %v2435_v19 = vsel %vm397_vm6, %v2230_v60, %v394_v59  ;;  %v641_v34 = vadd.f32 %v638_v32, %v630_v46  ;;  %v530_v41 = vadd.f32 %v527_v18, %v518_v47  ;;  %v837_v63 = vadd.f32 %v834_v1, %v826_v43 }
 0x109   : > { %2965 = vst [vmem:[#allocation85_spill] sm:$0xff] %v2431_v30  ;;  %v744_v37 = vadd.f32 %v741_v17, %v733_v16  ;;  %v940_v26 = vadd.f32 %v937_v11, %v929_v61  ;;  %v526_v12 = vmul.f32 %v2168_v25, %v2412_v58  ;;  %v517_v20 = vadd.f32 %v514_v9, %v502_v4 }
 0x10a   : > { %v431_v2 = vpop.permute.xlu0 %430  ;;  %v2439_v62 = vpop.permute.xlu1 %432  ;;  %v542_v48 = vmul.f32 %v2084_v50, %v2425_v45  ;;  %v525_v0 = vmul.f32 %v2168_v25, %v2398_v42  ;;  %v636_v46 = vmul.f32 %v2156_v21, %v2398_v42  ;;  %v516_v18 = vadd.f32 %v513_v35, %v2344_v54 }
 0x10b   : > { %2966 = vst [vmem:[#allocation86_spill] sm:$0xff] %v2439_v62  ;;  %v2449_v16 = vsel %vm434_vm7, %v2280_v38, %v431_v2  ;;  %v2453_v17 = vsel %vm434_vm7, %v431_v2, %v2439_v62  ;;  %v541_v47 = vmul.f32 %v2084_v50, %v2435_v19  ;;  %v660_v25 = vmul.f32 %v2160_v23, %v2439_v62 }
 0x10c   : > { %v555_v60 = vmul.f32 %v2177_v27, %v2439_v62  ;;  %v529_v32 = vadd.f32 %v526_v12, %v517_v20  ;;  %v628_v38 = vadd.f32 %v625_v10, %v2347_v55  ;;  %v856_v4 = vmul.f32 %v2200_v36, %v2439_v62 }
 0x10d   : > { %v763_v43 = vmul.f32 %v2260_v7, %v2439_v62  ;;  %v959_v35 = vmul.f32 %v2276_v33, %v2439_v62  ;;  %v554_v54 = vmul.f32 %v2177_v27, %v2453_v17  ;;  %v528_v11 = vadd.f32 %v525_v0, %v516_v18 }
 0x10e   : > { %v538_v61 = vpop.permute.xlu0 %537  ;;  %v451_v1 = vpop.permute.xlu1 %450  ;;  %v545_v59 = vadd.f32 %v542_v48, %v529_v32  ;;  %v553_v9 = vmul.f32 %v2177_v27, %v2449_v16  ;;  %v639_v10 = vadd.f32 %v636_v46, %v628_v38  ;;  %v647_v12 = vmul.f32 %v2088_v51, %v2435_v19 }
 0x10f   : > { %v2474_v55 = vsel %vm397_vm6, %v396_v28, %v538_v61  ;;  %v658_v2 = vmul.f32 %v2160_v23, %v2449_v16  ;;  %v615_v20 = vmul.f32 %v1976_v14, %v2331_v40  ;;  %v2494_v18 = vsel %vm454_vm8, %v2282_v39, %v451_v1 }
 0x110   : > { %2967 = vst [vmem:[#allocation87_spill] sm:$0xff] %v2474_v55  ;;  %v543_v48 = vmul.f32 %v2474_v55, %v2084_v50  ;;  %v649_v0 = vmul.f32 %v2088_v51, %v2474_v55  ;;  %v752_v27 = vmul.f32 %v2096_v52, %v2474_v55  ;;  %v845_v28 = vmul.f32 %v2100_v53, %v2474_v55 }
 0x111   : > { %v948_v46 = vmul.f32 %v2142_v8, %v2474_v55  ;;  %v557_v14 = vadd.f32 %v554_v54, %v545_v59  ;;  %v544_v32 = vadd.f32 %v541_v47, %v528_v11  ;;  %v2969_v8 = vld [vmem:[#allocation57_spill] sm:$0xff]  ;;  %v2970_v54 = vld [vmem:[#allocation62_spill] sm:$0xff]  ;;  %vm1002_vm6 = vcmask 1006592  }
 0x112   : > { %v2496_v38 = vpop.permute.xlu0 %452  ;;  %v469_v50 = vpop.permute.xlu1 %468  ;;  %v652_v61 = vadd.f32 %v649_v0, %v641_v34  ;;  %v546_v30 = vadd.f32 %v543_v48, %v530_v41  ;;  %v848_v62 = vadd.f32 %v845_v28, %v837_v63  ;;  %v755_v33 = vadd.f32 %v752_v27, %v744_v37  ;;  %v2971_v41 = vld [vmem:[#allocation64_spill] sm:$0xff] }
 0x113   : > { %2968 = vst [vmem:[#allocation88_spill] sm:$0xff] %v2496_v38  ;;  %v2500_v36 = vsel %vm454_vm8, %v451_v1, %v2496_v38  ;;  %v671_v55 = vmul.f32 %v2164_v24, %v2496_v38  ;;  %v567_v39 = vmul.f32 %v2969_v8, %v2496_v38  ;;  %v867_v47 = vmul.f32 %v2970_v54, %v2496_v38 }
 0x114   : > { %v663_v59 = vadd.f32 %v660_v25, %v652_v61  ;;  %v558_v11 = vadd.f32 %v555_v60, %v546_v30  ;;  %v859_v53 = vadd.f32 %v856_v4, %v848_v62  ;;  %v766_v34 = vadd.f32 %v763_v43, %v755_v33  ;;  %v2972_v62 = vld [vmem:[#allocation60_spill] sm:$0xff]  ;;  %v2973_v60 = vld [vmem:[#allocation61_spill] sm:$0xff]  ;;  %v2974_v43 = vld [vmem:[#allocation63_spill] sm:$0xff] }
 0x115   : > { %v774_v37 = vmul.f32 %v2971_v41, %v2496_v38  ;;  %v951_v63 = vadd.f32 %v948_v46, %v940_v26  ;;  %v970_v1 = vmul.f32 %v2302_v5, %v2496_v38  ;;  %v566_v48 = vmul.f32 %v2969_v8, %v2500_v36  ;;  %v2975_v46 = vld [vmem:[#allocation65_spill] sm:$0xff] }
 0x116   : > { %v471_v0 = vpop.permute.xlu0 %470  ;;  %v2514_v27 = vpop.permute.xlu1 %472  ;;  %v674_v28 = vadd.f32 %v671_v55, %v663_v59  ;;  %v570_v29 = vadd.f32 %v567_v39, %v558_v11  ;;  %v870_v54 = vadd.f32 %v867_v47, %v859_v53  ;;  %v565_v30 = vmul.f32 %v2969_v8, %v2494_v18 }
 0x117   : > { %v2519_v33 = vsel %vm474_vm9, %v469_v50, %v471_v0  ;;  %v2523_v26 = vsel %vm474_vm9, %v471_v0, %v2514_v27  ;;  %v682_v25 = vmul.f32 %v2972_v62, %v2514_v27  ;;  %v579_v4 = vmul.f32 %v2973_v60, %v2514_v27 }
 0x118   : > { %v878_v55 = vmul.f32 %v2974_v43, %v2514_v27  ;;  %v777_v53 = vadd.f32 %v774_v37, %v766_v34  ;;  %v785_v8 = vmul.f32 %v2975_v46, %v2514_v27  ;;  %v962_v61 = vadd.f32 %v959_v35, %v951_v63 }
 0x119   : > { %v685_v50 = vadd.f32 %v682_v25, %v674_v28  ;;  %v582_v39 = vadd.f32 %v579_v4, %v570_v29  ;;  %v981_v47 = vmul.f32 %v2306_v3, %v2514_v27  ;;  %v626_v59 = vmul.f32 %v2013_v22, %v2372_v31 }
 0x11a   : > { %v973_v11 = vadd.f32 %v970_v1, %v962_v61  ;;  %v569_v0 = vadd.f32 %v566_v48, %v557_v14  ;;  %v578_v38 = vmul.f32 %v2973_v60, %v2523_v26  ;;  %v556_v5 = vadd.f32 %v553_v9, %v544_v32 }
 0x11b   : > { %701 = vrot.lane.b32.xlu1 %v685_v50, %s1633_s1  ;;  %598 = vrot.lane.b32.xlu0 %v582_v39, %s1634_s17  ;;  %v881_v35 = vadd.f32 %v878_v55, %v870_v54  ;;  %v577_v29 = vmul.f32 %v2973_v60, %v2519_v33  ;;  %v650_v34 = vadd.f32 %v647_v12, %v639_v10  ;;  %v2976_v39 = vld [vmem:[#allocation58_spill] sm:$0xff]  ;;  %vm1105_vm9 = vcmask 998400  }
 0x11c   : > { %v788_v37 = vadd.f32 %v785_v8, %v777_v53  ;;  %v984_v63 = vadd.f32 %v981_v47, %v973_v11  ;;  %v568_v22 = vadd.f32 %v565_v30, %v556_v5  ;;  %v669_v14 = vmul.f32 %v2164_v24, %v2494_v18 }
 0x11d   : > { %v661_v1 = vadd.f32 %v658_v2, %v650_v34  ;;  %v680_v9 = vmul.f32 %v2972_v62, %v2519_v33  ;;  %v629_v32 = vadd.f32 %v626_v59, %v615_v20  ;;  %v637_v48 = vmul.f32 %v2156_v21, %v2412_v58  ;;  %v2977_v59 = vld [vmem:[#allocation54_spill] sm:$0xff] }
 0x11e   : > { %v581_v28 = vadd.f32 %v578_v38, %v569_v0  ;;  %v580_v54 = vadd.f32 %v577_v29, %v568_v22  ;;  %v648_v25 = vmul.f32 %v2088_v51, %v2425_v45  ;;  %v659_v10 = vmul.f32 %v2160_v23, %v2453_v17 }
 0x11f   : > { %897 = vrot.lane.b32.xlu1 %v881_v35, %s1635_s26  ;;  %796 = vrot.lane.b32.xlu0 %v788_v37, %s1636_s27  ;;  %v672_v5 = vadd.f32 %v669_v14, %v661_v1  ;;  %v640_v12 = vadd.f32 %v637_v48, %v629_v32  ;;  %v670_v2 = vmul.f32 %v2164_v24, %v2500_v36  ;;  %v2981_v14 = vld [vmem:[#allocation50_spill] sm:$0xff] }
 0x120   : > { %v681_v21 = vmul.f32 %v2972_v62, %v2523_v26  ;;  %v718_v51 = vmul.f32 %v1980_v15, %v2331_v40  ;;  %v729_v23 = vmul.f32 %v2056_v44, %v2372_v31  ;;  %v740_v20 = vmul.f32 %v2256_v6, %v2412_v58 }
 0x121   : > { %v683_v38 = vadd.f32 %v680_v9, %v672_v5  ;;  %v651_v30 = vadd.f32 %v648_v25, %v640_v12  ;;  %v751_v60 = vmul.f32 %v2096_v52, %v2425_v45  ;;  %v762_v24 = vmul.f32 %v2260_v7, %v2453_v17 }
 0x122   : > { %v732_v4 = vadd.f32 %v729_v23, %v718_v51  ;;  %v731_v62 = vadd.f32 %v2383_v13, %v2351_v56  ;;  %v739_v15 = vmul.f32 %v2256_v6, %v2398_v42  ;;  %v750_v44 = vmul.f32 %v2096_v52, %v2435_v19  ;;  %v2982_v51 = vld [vmem:[#allocation47_spill] sm:$0xff] }
 0x123   : > { %1000 = vrot.lane.b32.xlu0 %v984_v63, %s1637_s28  ;;  %596 = vrot.lane.b32.xlu1 %v581_v28, %s1634_s17  ;;  %v662_v55 = vadd.f32 %v659_v10, %v651_v30  ;;  %v773_v53 = vmul.f32 %v2971_v41, %v2500_v36  ;;  %v784_v8 = vmul.f32 %v2975_v46, %v2523_v26 }
 0x124   : > { %v743_v61 = vadd.f32 %v740_v20, %v732_v4  ;;  %v742_v56 = vadd.f32 %v739_v15, %v731_v62  ;;  %v761_v6 = vmul.f32 %v2260_v7, %v2449_v16  ;;  %v772_v52 = vmul.f32 %v2971_v41, %v2494_v18  ;;  %v2978_v7 = vld [vmem:[#allocation59_spill] sm:$0xff] }
 0x125   : > { %v783_v13 = vmul.f32 %v2975_v46, %v2519_v33  ;;  %v824_v50 = vadd.f32 %v2386_v49, %v2354_v57  ;;  %v832_v47 = vmul.f32 %v2976_v39, %v2398_v42  ;;  %v843_v11 = vmul.f32 %v2977_v59, %v2435_v19  ;;  %v2979_v46 = vld [vmem:[#allocation62_spill] sm:$0xff] }
 0x126   : > { %v673_v0 = vadd.f32 %v670_v2, %v662_v55  ;;  %v754_v35 = vadd.f32 %v751_v60, %v743_v61  ;;  %v753_v29 = vadd.f32 %v750_v44, %v742_v56  ;;  %v854_v34 = vmul.f32 %v2978_v7, %v2449_v16  ;;  %v2980_v49 = vld [vmem:[#allocation46_spill] sm:$0xff] }
 0x127   : > { %594 = vrot.lane.b32.xlu0 %v580_v54, %s1634_s17  ;;  %697 = vrot.lane.b32.xlu1 %v683_v38, %s1633_s1  ;;  %v835_v41 = vadd.f32 %v832_v47, %v824_v50  ;;  %v865_v57 = vmul.f32 %v2979_v46, %v2494_v18  ;;  %v811_v37 = vmul.f32 %v2980_v49, %v2331_v40  ;;  %v2984_v38 = vld [vmem:[#allocation66_spill] sm:$0xff]  ;;  %v2988_v50 = vld [vmem:[#allocation81_spill] sm:$0xff] }
 0x128   : > { %v765_v63 = vadd.f32 %v762_v24, %v754_v35  ;;  %v764_v22 = vadd.f32 %v761_v6, %v753_v29  ;;  %v822_v1 = vmul.f32 %v2981_v14, %v2372_v31  ;;  %v833_v9 = vmul.f32 %v2976_v39, %v2412_v58  ;;  %v2986_v6 = vld [vmem:[#allocation67_spill] sm:$0xff] }
 0x129   : > { %v684_v32 = vadd.f32 %v681_v21, %v673_v0  ;;  %v846_v48 = vadd.f32 %v843_v11, %v835_v41  ;;  %v876_v28 = vmul.f32 %v2974_v43, %v2519_v33  ;;  %v844_v54 = vmul.f32 %v2977_v59, %v2425_v45  ;;  %v2983_v21 = vld [vmem:[#allocation51_spill] sm:$0xff] }
 0x12a   : > { %v776_v25 = vadd.f32 %v773_v53, %v765_v63  ;;  %v775_v10 = vadd.f32 %v772_v52, %v764_v22  ;;  %v825_v5 = vadd.f32 %v822_v1, %v811_v37  ;;  %v855_v12 = vmul.f32 %v2978_v7, %v2453_v17  ;;  %v2985_v53 = vld [vmem:[#allocation55_spill] sm:$0xff]  ;;  %v2992_v37 = vld [vmem:[#allocation69_spill] sm:$0xff]  ;;  %v2993_v22 = vld [vmem:[#allocation56_spill] sm:$0xff] }
 0x12b   : > { %699 = vrot.lane.b32.xlu0 %v684_v32, %s1633_s1  ;;  %v857_v2 = vadd.f32 %v854_v34, %v846_v48  ;;  %v914_v23 = vmul.f32 %v2982_v51, %v2331_v40  ;;  %v925_v20 = vmul.f32 %v2983_v21, %v2372_v31  ;;  %v936_v30 = vmul.f32 %v2984_v38, %v2412_v58  ;;  %v2996_v51 = vld [vmem:[#allocation52_spill] sm:$0xff] }
 0x12c   : > { %v787_v60 = vadd.f32 %v784_v8, %v776_v25  ;;  %v836_v24 = vadd.f32 %v833_v9, %v825_v5  ;;  %v866_v4 = vmul.f32 %v2979_v46, %v2500_v36  ;;  %v877_v62 = vmul.f32 %v2974_v43, %v2523_v26  ;;  %v2987_v8 = vld [vmem:[#allocation76_spill] sm:$0xff]  ;;  %v2990_v46 = vld [vmem:[#allocation77_spill] sm:$0xff]  ;;  %v2994_v25 = vld [vmem:[#allocation70_spill] sm:$0xff] }
 0x12d   : > { %v786_v15 = vadd.f32 %v783_v13, %v775_v10  ;;  %v868_v44 = vadd.f32 %v865_v57, %v857_v2  ;;  %v928_v55 = vadd.f32 %v925_v20, %v914_v23  ;;  %v947_v61 = vmul.f32 %v2985_v53, %v2425_v45  ;;  %v2989_v13 = vld [vmem:[#allocation68_spill] sm:$0xff]  ;;  %v2991_v57 = vld [vmem:[#allocation82_spill] sm:$0xff]  ;;  %v2997_v20 = vld [vmem:[#allocation87_spill] sm:$0xff] }
 0x12e   : > { %794 = vrot.lane.b32.xlu1 %v787_v60, %s1636_s27  ;;  %v847_v56 = vadd.f32 %v844_v54, %v836_v24  ;;  %v958_v52 = vmul.f32 %v2986_v6, %v2453_v17  ;;  %v927_v39 = vadd.f32 %v2988_v50, %v2987_v8  ;;  %v935_v47 = vmul.f32 %v2984_v38, %v2398_v42  ;;  %v2998_v60 = vld [vmem:[#allocation71_spill] sm:$0xff]  ;;  %v3003_v50 = vld [vmem:[#allocation53_spill] sm:$0xff] }
 0x12f   : > { %792 = vrot.lane.b32.xlu0 %v786_v15, %s1636_s27  ;;  %v939_v43 = vadd.f32 %v936_v30, %v928_v55  ;;  %v969_v59 = vmul.f32 %v2989_v13, %v2500_v36  ;;  %v980_v11 = vmul.f32 %v2306_v3, %v2523_v26  ;;  %v946_v0 = vmul.f32 %v2985_v53, %v2435_v19 }
 0x130   : > { %v879_v35 = vadd.f32 %v876_v28, %v868_v44  ;;  %v858_v29 = vadd.f32 %v855_v12, %v847_v56  ;;  %v938_v7 = vadd.f32 %v935_v47, %v927_v39  ;;  %v957_v34 = vmul.f32 %v2986_v6, %v2449_v16  ;;  %v3001_v56 = vld [vmem:[#allocation83_spill] sm:$0xff] }
 0x131   : > { %v950_v41 = vadd.f32 %v947_v61, %v939_v43  ;;  %v1030_v49 = vadd.f32 %v2991_v57, %v2990_v46  ;;  %v1038_v63 = vmul.f32 %v2992_v37, %v2398_v42  ;;  %v1049_v14 = vmul.f32 %v2993_v22, %v2435_v19  ;;  %v2995_v42 = vld [vmem:[#allocation48_spill] sm:$0xff]  ;;  %v3000_v61 = vld [vmem:[#allocation78_spill] sm:$0xff]  ;;  %v3006_v46 = vld [vmem:[#allocation49_spill] sm:$0xff] }
 0x132   : > { %893 = vrot.lane.b32.xlu1 %v879_v35, %s1635_s26  ;;  %v869_v1 = vadd.f32 %v866_v4, %v858_v29  ;;  %v949_v9 = vadd.f32 %v946_v0, %v938_v7  ;;  %v968_v32 = vmul.f32 %v2989_v13, %v2494_v18  ;;  %v979_v48 = vmul.f32 %v2306_v3, %v2519_v33  ;;  %v3004_v7 = vld [vmem:[#allocation86_spill] sm:$0xff] }
 0x133   : > { %v961_v28 = vadd.f32 %v958_v52, %v950_v41  ;;  %v1041_v54 = vadd.f32 %v1038_v63, %v1030_v49  ;;  %v1060_v10 = vmul.f32 %v2994_v25, %v2449_v16  ;;  %v1017_v5 = vmul.f32 %v2995_v42, %v2331_v40  ;;  %v3002_v52 = vld [vmem:[#allocation80_spill] sm:$0xff] }
 0x134   : > { %v880_v12 = vadd.f32 %v877_v62, %v869_v1  ;;  %v960_v2 = vadd.f32 %v957_v34, %v949_v9  ;;  %v1028_v23 = vmul.f32 %v2996_v51, %v2372_v31  ;;  %v1039_v21 = vmul.f32 %v2992_v37, %v2412_v58  ;;  %v2999_v62 = vld [vmem:[#allocation72_spill] sm:$0xff]  ;;  %v3005_v34 = vld [vmem:[#allocation45_spill] sm:$0xff] }
 0x135   : > { %v1051_v38 = vmul.f32 %v2993_v22, %v2997_v20  ;;  %v972_v3 = vadd.f32 %v969_v59, %v961_v28  ;;  %v1052_v30 = vadd.f32 %v1049_v14, %v1041_v54  ;;  %v1071_v24 = vmul.f32 %v2998_v60, %v2494_v18  ;;  %v3009_v14 = vld [vmem:[#allocation84_spill] sm:$0xff]  ;;  %v3010_v28 = vld [vmem:[#allocation73_spill] sm:$0xff]  ;;  %v3013_v20 = vld [vmem:[#allocation75_spill] sm:$0xff] }
 0x136   : > { %895 = vrot.lane.b32.xlu0 %v880_v12, %s1635_s26  ;;  %v971_v4 = vadd.f32 %v968_v32, %v960_v2  ;;  %v1082_v15 = vmul.f32 %v2999_v62, %v2519_v33  ;;  %v1031_v44 = vadd.f32 %v1028_v23, %v1017_v5  ;;  %v1050_v55 = vmul.f32 %v2993_v22, %v2425_v45  ;;  %v3008_v22 = vld [vmem:[#allocation79_spill] sm:$0xff]  ;;  %v3012_v12 = vld [vmem:[#allocation85_spill] sm:$0xff] }
 0x137   : > { %v983_v53 = vadd.f32 %v980_v11, %v972_v3  ;;  %v1063_v58 = vadd.f32 %v1060_v10, %v1052_v30  ;;  %v1032_v6 = vadd.f32 %v3001_v56, %v3000_v61  ;;  %v1040_v8 = vmul.f32 %v2992_v37, %v3002_v52  ;;  %v3007_v37 = vld [vmem:[#allocation88_spill] sm:$0xff]  ;;  %v3011_v10 = vld [vmem:[#allocation74_spill] sm:$0xff] }
 0x138   : > { %v402_v39 = vmul.f32 %v2435_v19, %v3003_v50  ;;  %v982_v47 = vadd.f32 %v979_v48, %v971_v4  ;;  %v1042_v43 = vadd.f32 %v1039_v21, %v1031_v44  ;;  %v1061_v13 = vmul.f32 %v2994_v25, %v2453_v17 }
 0x139   : > { %v403_v59 = vmul.f32 %v2425_v45, %v3003_v50  ;;  %998 = vrot.lane.b32.xlu1 %v983_v53, %s1637_s28  ;;  %v1074_v11 = vadd.f32 %v1071_v24, %v1063_v58  ;;  %v1072_v0 = vmul.f32 %v2998_v60, %v2500_v36  ;;  %v1043_v35 = vadd.f32 %v1040_v8, %v1032_v6 }
 0x13a   : > { %996 = vrot.lane.b32.xlu0 %v982_v47, %s1637_s28  ;;  %v1053_v29 = vadd.f32 %v1050_v55, %v1042_v43  ;;  %v1062_v19 = vmul.f32 %v2994_v25, %v3004_v7  ;;  %v326_v41 = vmul.f32 %v2331_v40, %v3005_v34  ;;  %v346_v57 = vmul.f32 %v2372_v31, %v3006_v46 }
 0x13b   : > { %v1085_v45 = vadd.f32 %v1082_v15, %v1074_v11  ;;  %v1054_v49 = vadd.f32 %v1051_v38, %v1043_v35  ;;  %v1073_v63 = vmul.f32 %v2998_v60, %v3007_v37  ;;  %v367_v1 = vadd.f32 %v3009_v14, %v3008_v22 }
 0x13c   : > { %v1064_v9 = vadd.f32 %v1061_v13, %v1053_v29  ;;  %v1083_v32 = vmul.f32 %v2999_v62, %v2523_v26  ;;  %v348_v48 = vadd.f32 %v346_v57, %v326_v41  ;;  %v439_v54 = vmul.f32 %v2449_v16, %v3010_v28 }
 0x13d   : > { %1099 = vrot.lane.b32.xlu1 %v1085_v45, %s1638_s22  ;;  %v1065_v40 = vadd.f32 %v1062_v19, %v1054_v49  ;;  %v1084_v31 = vmul.f32 %v2999_v62, %v2514_v27  ;;  %v404_v25 = vadd.f32 %v402_v39, %v367_v1  ;;  %v459_v42 = vmul.f32 %v2494_v18, %v3011_v10 }
 0x13e   : > { %v1075_v5 = vadd.f32 %v1072_v0, %v1064_v9  ;;  %v368_v2 = vadd.f32 %v3012_v12, %v348_v48  ;;  %v440_v51 = vmul.f32 %v2453_v17, %v3010_v28  ;;  %v479_v16 = vmul.f32 %v2519_v33, %v3013_v20 }
 0x13f   : > { %v1076_v23 = vadd.f32 %v1073_v63, %v1065_v40  ;;  %v441_v21 = vadd.f32 %v439_v54, %v404_v25  ;;  %v460_v27 = vmul.f32 %v2500_v36, %v3011_v10  ;;  %v480_v24 = vmul.f32 %v2523_v26, %v3013_v20 }
 0x140   : > { %v1086_v38 = vadd.f32 %v1083_v32, %v1075_v5  ;;  %v405_v3 = vadd.f32 %v403_v59, %v368_v2  ;;  %v3014_v61 = vlaneseq }
 0x141   : > { %v1087_v30 = vadd.f32 %v1084_v31, %v1076_v23  ;;  %v461_v60 = vadd.f32 %v459_v42, %v441_v21 }
 0x142   : > { %1101 = vrot.lane.b32.xlu0 %v1086_v38, %s1638_s22  ;;  %v442_v18 = vadd.f32 %v440_v51, %v405_v3  ;;  %v266_v36 = vand.u32 127, %v3014_v61 }
 0x143   : > { %1103 = vrot.lane.b32.xlu1 %v1087_v30, %s1638_s22  ;;  %v481_v4 = vadd.f32 %v479_v16, %v461_v60 }
 0x144   : > { %v462_v17 = vadd.f32 %v460_v27, %v442_v18  ;;  %v267_v6 = vadd.s32 128, %v266_v36  ;;  %v272_v39 = vand.u32 15, %v266_v36 }
 0x146   : > { %v482_v62 = vadd.f32 %v480_v24, %v462_v17  ;;  %v279_v50 = vand.u32 15, %v267_v6  ;;  %v583_v43 = vadd.s32 4294967294, %v272_v39  ;;  %v483_v0 = vadd.s32 4294967293, %v272_v39 }
 0x147   : > { %v686_v35 = vadd.s32 4294967295, %v272_v39  ;;  %v882_v22 = vadd.s32 1, %v272_v39  ;;  %v985_v28 = vadd.s32 2, %v272_v39  ;;  %v1088_v12 = vadd.s32 3, %v272_v39 }
 0x148   : > { %v584_v26 = vadd.s32 4294967294, %v279_v50  ;;  %v484_v13 = vadd.s32 4294967293, %v279_v50  ;;  %v687_v59 = vadd.s32 4294967295, %v279_v50  ;;  %vm585_vm13 = vcmp.ge.s32.totalorder %v583_v43, 0 }
 0x149   : > { %vm485_vm0 = vcmp.ge.s32.totalorder %v483_v0, 0  ;;  %vm688_vm1 = vcmp.ge.s32.totalorder %v686_v35, 0  ;;  %v883_v45 = vadd.s32 1, %v279_v50  ;;  %vm886_vm5 = vcmp.lt.s32.totalorder %v882_v22, 16 }
 0x14a   : > { %vm586_vm12 = vcmp.ge.s32.totalorder %v584_v26, 0  ;;  %vm486_vm14 = vcmp.ge.s32.totalorder %v484_v13, 0  ;;  %vm689_vm15 = vcmp.ge.s32.totalorder %v687_v59, 0  ;;  %v491_v1 = vsel %vm485_vm0, %v481_v4, 0.0 }
 0x14b   : > { %v492_v37 = vsel %vm486_vm14, %v482_v62, 0.0  ;;  %vm887_vm4 = vcmp.lt.s32.totalorder %v883_v45, 16  ;;  %v986_v42 = vadd.s32 2, %v279_v50  ;;  %vm989_vm7 = vcmp.lt.s32.totalorder %v985_v28, 16 }
 0x14c   : > { %v1089_v38 = vadd.s32 3, %v279_v50 }
 0x14d   : > { %vm990_vm8 = vcmp.lt.s32.totalorder %v986_v42, 16 }
 0x18d   : > { %v702_v15 = vpop.permute.xlu1 %701  ;;  %v599_v44 = vpop.permute.xlu0 %598 }
 0x191   : > { %v898_v55 = vpop.permute.xlu1 %897  ;;  %v797_v33 = vpop.permute.xlu0 %796 }
 0x195   : > { %v2709_v53 = vpop.permute.xlu0 %1000  ;;  %v597_v58 = vpop.permute.xlu1 %596 }
 0x196   : > { %v602_v29 = vsel %vm600_vm10, %v597_v58, %v599_v44 }
 0x197   : > { %v606_v41 = vsel %vm586_vm12, %v602_v29, 0.0  ;;  %vm1114_vm12 = vcmask 1041408  }
 0x198   : > { %v608_v14 = vadd.f32 %v606_v41, %v492_v37 }
 0x199   : > { %v595_v56 = vpop.permute.xlu0 %594  ;;  %v698_v52 = vpop.permute.xlu1 %697 }
 0x19a   : > { %v601_v7 = vsel %vm600_vm10, %v595_v56, %v597_v58  ;;  %vm1092_vm10 = vcmp.lt.s32.totalorder %v1088_v12, 16 }
 0x19b   : > { %v605_v57 = vsel %vm585_vm13, %v601_v7, 0.0  ;;  %vm1161_vm13 = vcmp.lt.s32.totalorder %v3014_v61, 256 }
 0x19c   : > { %v607_v32 = vadd.f32 %v605_v57, %v491_v1  ;;  %v1639_v57 = vmov 1966171168  }
 0x19d   : > { %v700_v8 = vpop.permute.xlu0 %699  ;;  %v1145_v45 = vunpack.c.l.s4 %v1639_v57 }
 0x19e   : > { %v705_v34 = vsel %vm703_vm11, %v700_v8, %v702_v15  ;;  %v704_v46 = vsel %vm703_vm11, %v698_v52, %v700_v8  ;;  %vm1093_vm11 = vcmp.lt.s32.totalorder %v1089_v38, 16 }
 0x19f   : > { %v709_v63 = vsel %vm689_vm15, %v705_v34, 0.0  ;;  %v708_v9 = vsel %vm688_vm1, %v704_v46, 0.0 }
 0x1a0   : > { %v795_v47 = vpop.permute.xlu1 %794  ;;  %v711_v54 = vadd.f32 %v709_v63, %v608_v14  ;;  %v710_v25 = vadd.f32 %v708_v9, %v607_v32  ;;  %v3017_v63 = vld [vmem:[#allocation25_spill] sm:$0xff] }
 0x1a1   : > { %v793_v11 = vpop.permute.xlu0 %792  ;;  %v800_v2 = vsel %vm798_vm3, %v795_v47, %v797_v33 }
 0x1a2   : > { %v799_v5 = vsel %vm798_vm3, %v793_v11, %v795_v47  ;;  %v804_v20 = vadd.f32 %v800_v2, %v711_v54 }
 0x1a3   : > { %v803_v3 = vadd.f32 %v799_v5, %v710_v25 }
 0x1a4   : > { %v894_v19 = vpop.permute.xlu1 %893 }
 0x1a8   : > { %v896_v49 = vpop.permute.xlu0 %895 }
 0x1a9   : > { %v901_v40 = vsel %vm899_vm2, %v896_v49, %v898_v55  ;;  %v900_v10 = vsel %vm899_vm2, %v894_v19, %v896_v49  ;;  %v1146_v49 = vunpack.c.0.s8 %v1145_v45 }
 0x1aa   : > { %v905_v51 = vsel %vm887_vm4, %v901_v40, 0.0  ;;  %v904_v16 = vsel %vm886_vm5, %v900_v10, 0.0 }
 0x1ab   : > { %v999_v48 = vpop.permute.xlu1 %998  ;;  %v907_v27 = vadd.f32 %v905_v51, %v804_v20  ;;  %v906_v18 = vadd.f32 %v904_v16, %v803_v3  ;;  %v1149_v22 = vsub.s32 %v1146_v49, %v3017_v63 }
 0x1ac   : > { %v997_v31 = vpop.permute.xlu0 %996  ;;  %v1004_v30 = vsel %vm1002_vm6, %v999_v48, %v2709_v53 }
 0x1ad   : > { %v1003_v23 = vsel %vm1002_vm6, %v997_v31, %v999_v48  ;;  %v1008_v4 = vsel %vm990_vm8, %v1004_v30, 0.0 }
 0x1ae   : > { %v1007_v60 = vsel %vm989_vm7, %v1003_v23, 0.0  ;;  %v1010_v44 = vadd.f32 %v1008_v4, %v907_v27 }
 0x1af   : > { %v1100_v21 = vpop.permute.xlu1 %1099  ;;  %v1009_v17 = vadd.f32 %v1007_v60, %v906_v18 }
 0x1b4   : > { %v1102_v24 = vpop.permute.xlu0 %1101 }
 0x1b5   : > { %v1106_v62 = vsel %vm1105_vm9, %v1100_v21, %v1102_v24  ;;  %v1104_v15 = vpop.permute.xlu1 %1103 }
 0x1b6   : > { %v1110_v55 = vsel %vm1092_vm10, %v1106_v62, 0.0  ;;  %v1107_v33 = vsel %vm1105_vm9, %v1102_v24, %v1104_v15 }
 0x1b7   : > { %v1112_v58 = vadd.f32 %v1110_v55, %v1009_v17  ;;  %v1111_v36 = vsel %vm1093_vm11, %v1107_v33, 0.0 }
 0x1b8   : > { %v1113_v56 = vadd.f32 %v1111_v36, %v1010_v44 }
 0x1b9   : > { %v1115_v6 = vsel %vm1114_vm12, %v1112_v58, 0.0 }
 0x1ba   : > { %v1116_v52 = vrot.slane %v1115_v6, 4  ;;  %v1122_v53 = vsel %vm1114_vm12, %v1113_v56, 0.0 }
 0x1bb   : > { %v1123_v8 = vrot.slane %v1122_v53, 4 }
 0x1bc   : > { %v1117_v50 = vadd.f32 %v1116_v52, %v1115_v6 }
 0x1bd   : > { %v1124_v39 = vadd.f32 %v1123_v8, %v1122_v53 }
 0x1be   : > { %v1118_v26 = vrot.slane %v1117_v50, 2 }
 0x1bf   : > { %v1125_v47 = vrot.slane %v1124_v39, 2 }
 0x1c0   : > { %v1119_v43 = vadd.f32 %v1118_v26, %v1117_v50 }
 0x1c1   : > { %v1126_v13 = vadd.f32 %v1125_v47, %v1124_v39 }
 0x1c2   : > { %v1120_v59 = vrot.slane %v1119_v43, 1 }
 0x1c3   : > { %v1127_v11 = vrot.slane %v1126_v13, 1 }
 0x1c4   : > { %v1121_v0 = vadd.f32 %v1120_v59, %v1119_v43 }
 0x1c5   : > { %v1128_v35 = vadd.f32 %v1127_v11, %v1126_v13 }
 0x1c6   : > { %v1382_v29 = vmul.f32 -1.442695, %v1121_v0 }
 0x1c7   : > { %v1383_v7 = vmul.f32 -1.442695, %v1128_v35 }
 0x1c8   : > { %1483 = vpow2.f32 %v1382_v29 }
 0x1c9   : > { %1485 = vpow2.f32 %v1383_v7 }
 0x1d2   : > { %v1484_v19 = vpop.eup %1483 }
 0x1d3   : > { %v1486_v34 = vpop.eup %1485  ;;  %v1135_v41 = vadd.f32 1.0, %v1484_v19 }
 0x1d4   : > { %v1136_v46 = vadd.f32 1.0, %v1486_v34 }
 0x1d5   : > { %1487 = vrcp.f32 %v1135_v41 }
 0x1d6   : > { %1489 = vrcp.f32 %v1136_v46 }
 0x1df   : > { %v1488_v37 = vpop.eup %1487 }
 0x1e0   : > { %v1490_v14 = vpop.eup %1489 }
 0x1e1   : > { %v1143_v1 = vcombine.low %v1488_v37, %v1490_v14 }
 0x1e3   : > { %v1150_v9 = vrot.slane %v1143_v1, %v1149_v22 }
 0x1e5   : > { %v1157_v32 = vrot.slane %v1150_v9, %v1149_v22 }
 0x1e7   : > { %1163 = vst.msk [vmem:[%s187_s20] sm:$0x3] %vm1161_vm13, %v1157_v32 }
 0x1e8   : > { %1547 = shalt.err (!%p1544_p11)
}
 0x1e9   : > { %s1548_s4 = scalar_lea.hbm %s2720_s0, 32  ;;  %s1552_s8 = scalar_lea.hbm %s3019_s15, 64 }
 0x1ea   : > { %p1549_p13 = scmp.ne.s32.totalorder %s2720_s0, %s1548_s4  ;;  %p1553_p6 = scmp.lt.u32.totalorder %s2720_s0, %s3019_s15 }
 0x1eb   : > { %p1554_p9 = scmp.lt.u32.totalorder %s1552_s8, %s1548_s4  ;;  %p1556_p4 = scmp.lt.u32.totalorder %s1548_s4, %s2720_s0 }
 0x1ec   : > { %p1550_p7 = pnand %p1549_p13, %p3020_p8 }
 0x1ed   : > { %p1555_p1 = por %p1554_p9, %p1553_p6 }
 0x1ee   : > { %p1551_p10 = pneg %p1550_p7 }
 0x1ef   : > { %p1557_p2 = por %p1556_p4, %p1555_p1 }
 0x1f1   : > { %p1558_p12 = pnand %p1557_p2, %p1551_p10 }
 0x1f3   : > { %1561 = shalt.err (!%p1558_p12)
}
 0x1f4   : > { %1397 = dma.vmem_to_hbm [thread:$0]  (%p3020_p8), %s2722_s16, 32, %s2720_s0, %s1165_s30  }
 0x1f5 PF: > { %s3021_s6 = sld [smem:[#allocation14_spill]]  ;;  %s3022_s13 = sld [smem:[#allocation20_spill]] }
 0x1f6   : > { %s3023_s14 = sld [smem:[#allocation19_spill]] }
 0x1fb   : > { %s1191_s1 = sand.u32 1, %s3021_s6   ;;  %p3024_p0 = scmp.ne.s32.totalorder %s3022_s13, 0 }
 0x1fc   : > { %p3025_p3 = scmp.ge.s32.totalorder %s3023_s14, 2  ;;  %s1192_s17 = scalar_lea.sflag [#allocation7], %s1191_s1 }
 0x1fe   : > { %p1408_p5 = pnand %p3025_p3, %p3024_p0 }
 0x200   : > { %1595 = dma.done.wait (!%p1408_p5), %s1192_s17, 32  }
 0x201   : > { %1597 = vsyncadd (!%p1408_p5), %s1192_s17, 4294967264  ;;  %s19_s14 = sadd.s32 1, %s3023_s14   ;;  %s3026_s9 = sld [smem:[#allocation15_spill]] }
 0x202   : > { %p16_p11 = scmp.ge.s32.totalorder %s19_s14, 4   ;;  %s3027_s10 = sld [smem:[#allocation16_spill]] }
 0x203   : > { %s3028_s11 = sld [smem:[#allocation23_spill]]  ;;  %s3029_s12 = sld [smem:[#allocation18_spill]] }
 0x204   : > { %s3030_s13 = sld [smem:[#allocation21_spill]]  ;;  %18 = sbr.rel (!%p16_p11) target bundleno = 11 (0xb), region = 86 }
 0x20b   :  { %1197 = vsyncpa [#allocation6], 1 }
 0x20c   :  { %1199 = vsyncpa [#allocation6 + $0x1], 1 }
 0x20d   :  { %1200 = vsyncpa [#allocation7], 1 }
 0x20e   :  { %1202 = vsyncpa [#allocation7 + $0x1], 1 }
 0x20f   :  { %1203 = vsyncpa [#allocation8], 1 }
 0x210   :  { %1205 = vsyncpa [#allocation8 + $0x1], 1 }

</bundles_post_ra>
